<compile_context>
chip_gen: v7x
topology: tpu7x:2x2x1
jax: 0.10.0
libtpu: 0.0.40
codegen_flags: <defaults>
</compile_context>

<pallas_src>
import functools
import numpy as np
import jax
import jax.numpy as jnp
from jax import lax
from jax.experimental import pallas as pl
from jax.experimental.pallas import tpu as pltpu

NUM_LEVELS = 4   # PillarRes18BackBone8x stages: strides 1, 2, 4, 8
OUT_W = 128      # lane-dense packed output width: [pc0, counts_0..ns-1, 0...]


def _round_up(x, m):
    return ((x + m - 1) // m) * m


# ----------------------------------------------------------------------------
# Host-side (numpy) constants for the finalize path.
# ----------------------------------------------------------------------------
def _np_pool_matrix(n_out, n_in):
    # Row o is 1 on columns {2o-1, 2o, 2o+1}: 3x3 / stride-2 / pad-1 max-pool
    # (occupancy dilation of a stride-2 sparse conv) as a matmul on binary maps.
    o = np.arange(n_out)[:, None]
    i = np.arange(n_in)[None, :]
    d = i - 2 * o
    return ((d >= -1) & (d <= 1)).astype(np.float32)


def _np_slice_matrix(out_w, n_rows, slice_w, num_slices, include_pc0):
    # (out_w, n_rows): output lane c (1 <= c <= num_slices) selects the y-rows of
    # slice c-1; lane 0 selects every row (pc0 total, stride-1 level only).
    cidx = np.arange(out_w)[:, None]
    y = np.arange(n_rows)[None, :]
    sel = (cidx >= 1) & (cidx <= num_slices) & ((y // slice_w) == (cidx - 1))
    if include_pc0:
        sel = sel | (cidx == 0)
    return sel.astype(np.float32)


def _build_finalize_consts(H, W, slice_sz, num_slices, num_levels, out_w):
    # Stacked + zero-padded so only three small constant inputs are needed:
    #   pool_h : (L-1, H/2, H)   level-l row-pool matrix at [l-1, :H>>l, :H>>(l-1)]
    #   pool_wt: (L-1, W, W/2)   level-l col-pool matrix (transposed)
    #   slice_m: (L,   out_w, H) level-l slice-selection matrix at [l, :, :H>>l]
    pool_h = np.zeros((num_levels - 1, H // 2, H), np.float32)
    pool_wt = np.zeros((num_levels - 1, W, W // 2), np.float32)
    slice_m = np.zeros((num_levels, out_w, H), np.float32)
    h, w = H, W
    for lvl in range(num_levels):
        if lvl > 0:
            pool_h[lvl - 1, : h // 2, : h] = _np_pool_matrix(h // 2, h)
            pool_wt[lvl - 1, : w, : w // 2] = _np_pool_matrix(w // 2, w).T
            h //= 2
            w //= 2
        slice_m[lvl, :, : h] = _np_slice_matrix(
            out_w, h, slice_sz >> lvl, num_slices, include_pc0=(lvl == 0))
    return (jnp.asarray(pool_h, jnp.bfloat16),
            jnp.asarray(pool_wt, jnp.bfloat16),
            jnp.asarray(slice_m, jnp.bfloat16))


# ----------------------------------------------------------------------------
# Kernel
# ----------------------------------------------------------------------------
def _pillar_counter_kernel(mins_ref, ps_ref, nvalid_ref, py_ref, px_ref,
                           pool_h_ref, pool_wt_ref, slice_ref,
                           out_ref, acc_ref,
                           *, num_levels, out_w, k_tile, oh_dtype):
    r = pl.program_id(0)          # resolution (parallel)
    c = pl.program_id(1)          # point chunk (arbitrary / reduction)
    n_chunks = pl.num_programs(1)
    H, W = acc_ref.shape
    NC = py_ref.shape[-1]
    n_tiles = NC // k_tile

    @pl.when(c == 0)
    def _init():
        acc_ref[...] = jnp.zeros_like(acc_ref)

    minx = mins_ref[r, 0]
    miny = mins_ref[r, 1]
    psx = ps_ref[r, 0]
    psy = ps_ref[r, 1]

    # Skip chunks that contain no valid points (sentinel-only padding).
    @pl.when(nvalid_ref[c] > 0)
    def _scatter():
        def body(t, acc):
            off = pl.multiple_of(t * k_tile, k_tile)
            py = py_ref[:, pl.ds(off, k_tile)]            # (1, KT)  lanes = points
            px = px_ref[:, pl.ds(off, k_tile)]            # (1, KT)
            # float -> int32 truncates toward zero, matching torch .int();
            # sentinel lanes land far outside [0,H)x[0,W) -> all-zero columns.
            cy = ((py - miny) / psy).astype(jnp.int32)    # (1, KT)
            cx = ((px - minx) / psx).astype(jnp.int32)    # (1, KT)
            oh_y = (lax.broadcasted_iota(jnp.int32, (H, k_tile), 0) == cy).astype(oh_dtype)
            oh_x = (lax.broadcasted_iota(jnp.int32, (W, k_tile), 0) == cx).astype(oh_dtype)
            # Scatter-as-one-hot-matmul on the MXU: contract the point (lane)
            # dims of both one-hots (q@k.T pattern); duplicates just raise the
            # per-cell count, occupancy is (count > 0).
            return acc + lax.dot_general(
                oh_y, oh_x, (((1,), (1,)), ((), ())),
                preferred_element_type=jnp.float32)       # (H, W)

        carry = lax.fori_loop(0, n_tiles, body,
                              jnp.zeros((H, W), jnp.float32), unroll=True)
        acc_ref[...] += carry

    @pl.when(c == n_chunks - 1)
    def _finalize():
        occ = (acc_ref[...] > 0.0).astype(jnp.bfloat16)   # (H, W) binary occupancy
        packed = jnp.zeros((1, out_w), jnp.float32)
        h, w = H, W
        for lvl in range(num_levels):
            if lvl > 0:
                # separable 3x3 / stride-2 / pad-1 occupancy pooling with the
                # host-built pool matrices (exact on binary maps).
                A = pool_h_ref[lvl - 1, 0:h // 2, 0:h]     # (h/2, h)  bf16
                Bt = pool_wt_ref[lvl - 1, 0:w, 0:w // 2]   # (w, w/2)  bf16
                t = jnp.dot(A, occ, preferred_element_type=jnp.float32)   # (h/2, w)
                tb = (t > 0.0).astype(jnp.bfloat16)
                s = jnp.dot(tb, Bt, preferred_element_type=jnp.float32)   # (h/2, w/2)
                occ = (s > 0.0).astype(jnp.bfloat16)
                h //= 2
                w //= 2
            S = slice_ref[lvl, :, 0:h]                     # (out_w, h) bf16
            per_lane = jnp.dot(S, occ, preferred_element_type=jnp.float32)  # (out_w, w)
            # Cold-path lane contraction (same supported pattern as q@k.T).
            ones_w = jnp.ones((1, w), jnp.float32)
            packed = packed + lax.dot_general(
                ones_w, per_lane, (((1,), (1,)), ((), ())),
                preferred_element_type=jnp.float32)        # (1, out_w)
        out_ref[...] = packed.reshape(1, 1, out_w)


# ----------------------------------------------------------------------------
# Module wrapper
# ----------------------------------------------------------------------------
class MultiPillarCounter:
    """JAX/Pallas port of the PyTorch MultiPillarCounter."""

    def __init__(self, pillar_sizes, pc_ranges, slice_sz=32,
                 chunk_size=1024, k_tile=128, onehot_dtype=jnp.bfloat16):
        pillar_sizes = np.asarray(pillar_sizes, np.float32)
        if pillar_sizes.shape[1] > 2:
            pillar_sizes = pillar_sizes[:, :2]
        pc_ranges = np.asarray(pc_ranges, np.float32)
        assert k_tile % 128 == 0, "k_tile must be a multiple of 128"
        assert chunk_size % k_tile == 0, "chunk_size must be a multiple of k_tile"
        self.num_res = len(pillar_sizes)
        self.slice_sz = int(slice_sz)
        self.chunk_size = int(chunk_size)
        self.k_tile = int(k_tile)
        # bf16 one-hots are exact for 0/1 and lower on every MXU generation.
        # On v7x, jnp.float8_e4m3fn halves one-hot bytes and doubles MXU rate.
        self.onehot_dtype = onehot_dtype
        self.grid_sizes = []
        self.num_slices = []
        mins = []
        for ps, rng in zip(pillar_sizes, pc_ranges):
            xy_len = rng[[3, 4]] - rng[[0, 1]]
            gs = np.round(xy_len / ps).astype(np.int64)
            self.grid_sizes.append([int(gs[0]), int(gs[1])])
            self.num_slices.append(int(gs[0] // slice_sz))
            mins.append(rng[[0, 1]])
        self.pillar_sizes_np = pillar_sizes
        self.pc_range_mins_np = np.stack(mins).astype(np.float32)
        self.pillar_sizes = jnp.asarray(pillar_sizes)
        self.pc_range_mins = jnp.asarray(self.pc_range_mins_np)
        self._const_cache = {}

    def _finalize_consts(self, fri):
        if fri not in self._const_cache:
            H, W = self.grid_sizes[fri]
            self._const_cache[fri] = _build_finalize_consts(
                H, W, self.slice_sz, self.num_slices[fri], NUM_LEVELS, OUT_W)
        return self._const_cache[fri]

    def forward(self, points_xy, first_res_idx=0, num_points=None):
        fri = first_res_idx
        R = self.num_res - fri
        H, W = self.grid_sizes[fri]
        ns = self.num_slices[fri]
        assert ns + 1 <= OUT_W
        assert H % (1 << (NUM_LEVELS - 1)) == 0 and W % (1 << (NUM_LEVELS - 1)) == 0

        n_rows = int(points_xy.shape[0])
        if num_points is None:
            num_points = n_rows
        if isinstance(num_points, (int, np.integer)):
            num_points = min(int(num_points), n_rows)
        else:
            num_points = jnp.minimum(num_points, n_rows)

        # Chunk the points along N (reduction grid axis).
        NC = min(self.chunk_size, _round_up(max(n_rows, 1), self.k_tile))
        n_pad = _round_up(max(n_rows, 1), NC)
        n_chunks = n_pad // NC

        pts = jnp.asarray(points_xy, jnp.float32)
        if n_pad > n_rows:
            pts = jnp.concatenate(
                [pts, jnp.zeros((n_pad - n_rows, 2), jnp.float32)], axis=0)
        # Every invalid row (caller padding and our own) is rewritten with a far
        # out-of-range sentinel -> all-zero one-hot columns in the kernel.
        sentinel = float(self.pc_range_mins_np.min()) - 1.0e4
        valid = jnp.arange(n_pad) < num_points
        pts = jnp.where(valid[:, None], pts, sentinel)
        px_lane = pts[:, 0].reshape(1, n_pad)      # x, lane-oriented
        py_lane = pts[:, 1].reshape(1, n_pad)      # y, lane-oriented

        # Per-chunk valid-point counts (SMEM) -> sentinel-only chunks are skipped.
        nvalid = jnp.clip(
            num_points - jnp.arange(n_chunks, dtype=jnp.int32) * NC, 0, NC
        ).astype(jnp.int32)

        mins = self.pc_range_mins[fri:]
        ps = self.pillar_sizes[fri:]
        pool_h, pool_wt, slice_m = self._finalize_consts(fri)

        kern = functools.partial(
            _pillar_counter_kernel, num_levels=NUM_LEVELS, out_w=OUT_W,
            k_tile=self.k_tile, oh_dtype=self.onehot_dtype)

        packed = pl.pallas_call(
            kern,
            grid=(R, n_chunks),
            in_specs=[
                pl.BlockSpec(memory_space=pltpu.MemorySpace.SMEM),   # pc_range_mins (R,2)
                pl.BlockSpec(memory_space=pltpu.MemorySpace.SMEM),   # pillar_sizes (R,2)
                pl.BlockSpec(memory_space=pltpu.MemorySpace.SMEM),   # nvalid (n_chunks,)
                pl.BlockSpec((1, NC), lambda r, c: (0, c)),          # points y (lanes)
                pl.BlockSpec((1, NC), lambda r, c: (0, c)),          # points x (lanes)
                pl.BlockSpec(pool_h.shape, lambda r, c: (0, 0, 0)),  # resident constants
                pl.BlockSpec(pool_wt.shape, lambda r, c: (0, 0, 0)),
                pl.BlockSpec(slice_m.shape, lambda r, c: (0, 0, 0)),
            ],
            out_specs=pl.BlockSpec((1, 1, OUT_W), lambda r, c: (r, 0, 0)),
            out_shape=jax.ShapeDtypeStruct((R, 1, OUT_W), jnp.float32),
            scratch_shapes=[pltpu.VMEM((H, W), jnp.float32)],
            compiler_params=pltpu.CompilerParams(
                dimension_semantics=("parallel", "arbitrary"),
                vmem_limit_bytes=32 * 1024 * 1024),
        )(mins, ps, nvalid, py_lane, px_lane, pool_h, pool_wt, slice_m)

        pc0 = packed[:, 0, 0]
        pillar_counts = packed[:, 0, 1:1 + ns]
        return pc0, pillar_counts.T    # matches torch: (pc0, pillar_counts.T)


# ----------------------------------------------------------------------------
# Pure-JAX reference with the same reconstructed semantics.
# ----------------------------------------------------------------------------
def _reference(points_xy, mins, ps, H, W, num_slices, slice_sz):
    R = mins.shape[0]
    coords = ((points_xy[:, None, :] - mins[None]) / ps[None]).astype(jnp.int32)  # (N,R,2)
    cx = coords[:, :, 0]
    cy = coords[:, :, 1]
    r_idx = jnp.broadcast_to(jnp.arange(R)[None, :], cx.shape)
    grid = jnp.zeros((R, H, W), jnp.float32)
    grid = grid.at[r_idx.reshape(-1), cy.reshape(-1), cx.reshape(-1)].set(1.0)
    pc0 = grid.sum(axis=(1, 2))
    occ = grid
    total = jnp.zeros((R, num_slices), jnp.float32)
    for lvl in range(NUM_LEVELS):
        if lvl > 0:
            occ = lax.reduce_window(occ, 0.0, lax.max, (1, 3, 3), (1, 2, 2),
                                    [(0, 0), (1, 1), (1, 1)])
        sl = slice_sz >> lvl
        w_l = occ.shape[2]
        sliced = occ[:, :num_slices * sl, :].reshape(R, num_slices, sl, w_l)
        total = total + sliced.sum(axis=(2, 3))
    return pc0, total.T


if __name__ == "__main__":
    key = jax.random.PRNGKey(0)

    # Two resolutions, same xy range [-12.8, 12.8]^2:
    #   res0: 0.2m pillars -> 128x128 grid, 4 slices of 32
    #   res1: 0.4m pillars ->  64x 64 grid
    pillar_sizes = np.array([[0.2, 0.2, 8.0], [0.4, 0.4, 8.0]], dtype=np.float32)
    pc_ranges = np.array([[-12.8, -12.8, -5.0, 12.8, 12.8, 3.0],
                          [-12.8, -12.8, -5.0, 12.8, 12.8, 3.0]], dtype=np.float32)
    # chunk_size=128 so the small test exercises multi-chunk accumulation, the
    # partial-chunk sentinel masking, and the sentinel-only-chunk skip:
    # 250 valid points inside a 512-row padded buffer -> nvalid = [128,122,0,0].
    counter = MultiPillarCounter(pillar_sizes, pc_ranges, slice_sz=32,
                                 chunk_size=128, k_tile=128)

    N_VALID = 250
    N_BUF = 512
    k1, k2 = jax.random.split(key)
    # Valid points at fine-grid cell centres (away from cell boundaries, so the
    # float->int truncation is robust across backends).
    cells = jax.random.randint(k1, (N_VALID, 2), 0, counter.grid_sizes[0][0])
    mins0 = jnp.asarray(counter.pc_range_mins_np[0])
    ps0 = jnp.asarray(counter.pillar_sizes_np[0])
    valid_pts = mins0[None, :] + (cells.astype(jnp.float32) + 0.5) * ps0[None, :]
    # In-range junk in the padding region: must be masked out by the kernel.
    junk = jax.random.uniform(k2, (N_BUF - N_VALID, 2), jnp.float32,
                              minval=-12.8, maxval=12.8)
    points_buf = jnp.concatenate([valid_pts, junk], axis=0).astype(jnp.float32)

    pc0, pillar_counts_t = counter.forward(points_buf, first_res_idx=0,
                                           num_points=N_VALID)
    (pc0, pillar_counts_t) = jax.block_until_ready((pc0, pillar_counts_t))

    ref_pc0, ref_counts_t = _reference(
        points_buf[:N_VALID], counter.pc_range_mins, counter.pillar_sizes,
        counter.grid_sizes[0][0], counter.grid_sizes[0][1],
        counter.num_slices[0], counter.slice_sz)

    assert np.allclose(np.asarray(pc0), np.asarray(ref_pc0)), (pc0, ref_pc0)
    assert np.allclose(np.asarray(pillar_counts_t), np.asarray(ref_counts_t)), (
        pillar_counts_t, ref_counts_t)

    print("KERNEL_OK")
</pallas_src>

<mosaic_0001>
module attributes {stable_mosaic.version = 11 : i64} {
  func.func @_pillar_counter_kernel(%arg0: i32, %arg1: i32, %arg2: memref<2x2xf32, #tpu.memory_space<smem>>, %arg3: memref<2x2xf32, #tpu.memory_space<smem>>, %arg4: memref<4xi32, #tpu.memory_space<smem>>, %arg5: memref<1x128xf32, #tpu.memory_space<vmem>>, %arg6: memref<1x128xf32, #tpu.memory_space<vmem>>, %arg7: memref<3x64x128xbf16, #tpu.memory_space<vmem>>, %arg8: memref<3x128x64xbf16, #tpu.memory_space<vmem>>, %arg9: memref<4x128x128xbf16, #tpu.memory_space<vmem>>, %arg10: memref<1x1x128xf32, #tpu.memory_space<vmem>>, %arg11: memref<128x128xf32, #tpu.memory_space<vmem>>) attributes {dimension_semantics = [#tpu.dimension_semantics<parallel>, #tpu.dimension_semantics<arbitrary>], iteration_bounds = array<i64: 2, 4>, scalar_prefetch = 0 : i64, scratch_operands = 1 : i64, tpu.core_type = #tpu.core_type<tc>, window_params = [{transform_indices = @transform_0, window_bounds = array<i64: 2, 2>}, {transform_indices = @transform_1, window_bounds = array<i64: 2, 2>}, {transform_indices = @transform_2, window_bounds = array<i64: 4>}, {transform_indices = @transform_3, window_bounds = array<i64: 1, 128>}, {transform_indices = @transform_4, window_bounds = array<i64: 1, 128>}, {pipeline_mode = #tpu.pipeline_mode<synchronous>, transform_indices = @transform_5, window_bounds = array<i64: 3, 64, 128>}, {pipeline_mode = #tpu.pipeline_mode<synchronous>, transform_indices = @transform_6, window_bounds = array<i64: 3, 128, 64>}, {pipeline_mode = #tpu.pipeline_mode<synchronous>, transform_indices = @transform_7, window_bounds = array<i64: 4, 128, 128>}, {transform_indices = @transform_8, window_bounds = array<i64: 1, 1, 128>}]} {
    %c0_i32 = arith.constant 0 : i32
    %0 = arith.cmpi eq, %arg1, %c0_i32 : i32
    %1 = arith.extui %0 : i1 to i32
    %c0_i32_0 = arith.constant 0 : i32
    %2 = arith.cmpi ne, %1, %c0_i32_0 : i32
    scf.if %2 {
      %cst = arith.constant 0.000000e+00 : f32
      %19 = vector.broadcast %cst : f32 to vector<128x128xf32>
      %c0_6 = arith.constant 0 : index
      %c0_7 = arith.constant 0 : index
      %20 = vector.load %arg11[%c0_6, %c0_7] : memref<128x128xf32, #tpu.memory_space<vmem>>, vector<128x128xf32>
      tpu.vector_store %arg11[%c0_6, %c0_7], %19 {strides = array<i32>} : memref<128x128xf32, #tpu.memory_space<vmem>>, vector<128x128xf32>,
    } else {
    }
    %3 = arith.index_cast %arg0 : i32 to index
    %c0 = arith.constant 0 : index
    %4 = memref.load %arg2[%3, %c0] : memref<2x2xf32, #tpu.memory_space<smem>>
    %5 = arith.index_cast %arg0 : i32 to index
    %c1 = arith.constant 1 : index
    %6 = memref.load %arg2[%5, %c1] : memref<2x2xf32, #tpu.memory_space<smem>>
    %7 = arith.index_cast %arg0 : i32 to index
    %c0_1 = arith.constant 0 : index
    %8 = memref.load %arg3[%7, %c0_1] : memref<2x2xf32, #tpu.memory_space<smem>>
    %9 = arith.index_cast %arg0 : i32 to index
    %c1_2 = arith.constant 1 : index
    %10 = memref.load %arg3[%9, %c1_2] : memref<2x2xf32, #tpu.memory_space<smem>>
    %11 = arith.index_cast %arg1 : i32 to index
    %12 = memref.load %arg4[%11] : memref<4xi32, #tpu.memory_space<smem>>
    %c0_i32_3 = arith.constant 0 : i32
    %13 = arith.cmpi sgt, %12, %c0_i32_3 : i32
    %14 = arith.extui %13 : i1 to i32
    %c0_i32_4 = arith.constant 0 : i32
    %15 = arith.cmpi ne, %14, %c0_i32_4 : i32
    scf.if %15 {
      %cst = arith.constant 0.000000e+00 : f32
      %19 = vector.broadcast %cst : f32 to vector<128x128xf32>
      %c0_i32_6 = arith.constant 0 : i32
      %c128_i32 = arith.constant 128 : i32
      %20 = arith.muli %c0_i32_6, %c128_i32 : i32
      %21 = tpu.assume_multiple %20, 128 : i32
      %c0_7 = arith.constant 0 : index
      %22 = arith.index_cast %21 : i32 to index
      %23 = vector.load %arg5[%c0_7, %22] : memref<1x128xf32, #tpu.memory_space<vmem>>, vector<1x128xf32>
      %c0_8 = arith.constant 0 : index
      %24 = arith.index_cast %21 : i32 to index
      %25 = vector.load %arg6[%c0_8, %24] : memref<1x128xf32, #tpu.memory_space<vmem>>, vector<1x128xf32>
      %26 = vector.broadcast %6 : f32 to vector<1x128xf32>
      %27 = arith.subf %23, %26 : vector<1x128xf32>
      %28 = vector.broadcast %10 : f32 to vector<1x128xf32>
      %29 = arith.divf %27, %28 : vector<1x128xf32>
      %30 = arith.fptosi %29 : vector<1x128xf32> to vector<1x128xi32>
      %31 = vector.broadcast %4 : f32 to vector<1x128xf32>
      %32 = arith.subf %25, %31 : vector<1x128xf32>
      %33 = vector.broadcast %8 : f32 to vector<1x128xf32>
      %34 = arith.divf %32, %33 : vector<1x128xf32>
      %35 = arith.fptosi %34 : vector<1x128xf32> to vector<1x128xi32>
      %36 = tpu.iota {dimensions = array<i32: 0>} : vector<128x128xi32>
      %37 = vector.broadcast %30 : vector<1x128xi32> to vector<128x128xi32>
      %38 = arith.cmpi eq, %36, %37 : vector<128x128xi32>
      %39 = arith.extui %38 : vector<128x128xi1> to vector<128x128xi32>
      %40 = arith.sitofp %39 : vector<128x128xi32> to vector<128x128xf32>
      %41 = arith.truncf %40 : vector<128x128xf32> to vector<128x128xbf16>
      %42 = tpu.iota {dimensions = array<i32: 0>} : vector<128x128xi32>
      %43 = vector.broadcast %35 : vector<1x128xi32> to vector<128x128xi32>
      %44 = arith.cmpi eq, %42, %43 : vector<128x128xi32>
      %45 = arith.extui %44 : vector<128x128xi1> to vector<128x128xi32>
      %46 = arith.sitofp %45 : vector<128x128xi32> to vector<128x128xf32>
      %47 = arith.truncf %46 : vector<128x128xf32> to vector<128x128xbf16>
      %cst_9 = arith.constant dense<0.000000e+00> : vector<128x128xf32>
      %48 = tpu.matmul %41, %47, %cst_9 {dimension_numbers = #tpu.dot_dimension_numbers<[1], [1], [0], [0], [0, 0, 1, 0], [], []>} : vector<128x128xbf16>, vector<128x128xbf16>, vector<128x128xf32> -> vector<128x128xf32>
      %49 = arith.addf %19, %48 : vector<128x128xf32>
      %c1_i32 = arith.constant 1 : i32
      %c0_10 = arith.constant 0 : index
      %c0_11 = arith.constant 0 : index
      %50 = vector.load %arg11[%c0_10, %c0_11] : memref<128x128xf32, #tpu.memory_space<vmem>>, vector<128x128xf32>
      %51 = arith.addf %50, %49 : vector<128x128xf32>
      %c0_12 = arith.constant 0 : index
      %c0_13 = arith.constant 0 : index
      %52 = vector.load %arg11[%c0_12, %c0_13] : memref<128x128xf32, #tpu.memory_space<vmem>>, vector<128x128xf32>
      tpu.vector_store %arg11[%c0_12, %c0_13], %51 {strides = array<i32>} : memref<128x128xf32, #tpu.memory_space<vmem>>, vector<128x128xf32>,
    } else {
    }
    %c3_i32 = arith.constant 3 : i32
    %16 = arith.cmpi eq, %arg1, %c3_i32 : i32
    %17 = arith.extui %16 : i1 to i32
    %c0_i32_5 = arith.constant 0 : i32
    %18 = arith.cmpi ne, %17, %c0_i32_5 : i32
    scf.if %18 {
      %c0_6 = arith.constant 0 : index
      %c0_7 = arith.constant 0 : index
      %19 = vector.load %arg11[%c0_6, %c0_7] : memref<128x128xf32, #tpu.memory_space<vmem>>, vector<128x128xf32>
      %cst = arith.constant 0.000000e+00 : f32
      %20 = vector.broadcast %cst : f32 to vector<128x128xf32>
      %21 = arith.cmpf ogt, %19, %20 : vector<128x128xf32>
      %22 = arith.extui %21 : vector<128x128xi1> to vector<128x128xi32>
      %23 = arith.sitofp %22 : vector<128x128xi32> to vector<128x128xf32>
      %24 = arith.truncf %23 : vector<128x128xf32> to vector<128x128xbf16>
      %cst_8 = arith.constant 0.000000e+00 : f32
      %25 = vector.broadcast %cst_8 : f32 to vector<1x128xf32>
      %c0_9 = arith.constant 0 : index
      %c0_10 = arith.constant 0 : index
      %c0_11 = arith.constant 0 : index
      %26 = vector.load %arg9[%c0_9, %c0_10, %c0_11] : memref<4x128x128xbf16, #tpu.memory_space<vmem>>, vector<1x128x128xbf16>
      %27 = vector.shape_cast %26 : vector<1x128x128xbf16> to vector<128x128xbf16>
      %cst_12 = arith.constant dense<0.000000e+00> : vector<128x128xf32>
      %28 = tpu.matmul %27, %24, %cst_12 {dimension_numbers = #tpu.dot_dimension_numbers<[1], [0], [0], [1], [0, 0, 1, 1], [], []>} : vector<128x128xbf16>, vector<128x128xbf16>, vector<128x128xf32> -> vector<128x128xf32>
      %cst_13 = arith.constant 1.000000e+00 : f32
      %29 = vector.broadcast %cst_13 : f32 to vector<1x128xf32>
      %cst_14 = arith.constant dense<0.000000e+00> : vector<1x128xf32>
      %30 = tpu.matmul %29, %28, %cst_14 {dimension_numbers = #tpu.dot_dimension_numbers<[1], [1], [0], [0], [0, 0, 1, 0], [], []>} : vector<1x128xf32>, vector<128x128xf32>, vector<1x128xf32> -> vector<1x128xf32>
      %31 = arith.addf %25, %30 : vector<1x128xf32>
      %c0_15 = arith.constant 0 : index
      %c0_16 = arith.constant 0 : index
      %c0_17 = arith.constant 0 : index
      %32 = vector.load %arg7[%c0_15, %c0_16, %c0_17] : memref<3x64x128xbf16, #tpu.memory_space<vmem>>, vector<1x64x128xbf16>
      %33 = vector.shape_cast %32 : vector<1x64x128xbf16> to vector<64x128xbf16>
      %c0_18 = arith.constant 0 : index
      %c0_19 = arith.constant 0 : index
      %c0_20 = arith.constant 0 : index
      %34 = vector.load %arg8[%c0_18, %c0_19, %c0_20] : memref<3x128x64xbf16, #tpu.memory_space<vmem>>, vector<1x128x64xbf16>
      %35 = vector.shape_cast %34 : vector<1x128x64xbf16> to vector<128x64xbf16>
      %cst_21 = arith.constant dense<0.000000e+00> : vector<64x128xf32>
      %36 = tpu.matmul %33, %24, %cst_21 {dimension_numbers = #tpu.dot_dimension_numbers<[1], [0], [0], [1], [0, 0, 1, 1], [], []>} : vector<64x128xbf16>, vector<128x128xbf16>, vector<64x128xf32> -> vector<64x128xf32>
      %cst_22 = arith.constant 0.000000e+00 : f32
      %37 = vector.broadcast %cst_22 : f32 to vector<64x128xf32>
      %38 = arith.cmpf ogt, %36, %37 : vector<64x128xf32>
      %39 = arith.extui %38 : vector<64x128xi1> to vector<64x128xi32>
      %40 = arith.sitofp %39 : vector<64x128xi32> to vector<64x128xf32>
      %41 = arith.truncf %40 : vector<64x128xf32> to vector<64x128xbf16>
      %cst_23 = arith.constant dense<0.000000e+00> : vector<64x64xf32>
      %42 = tpu.matmul %41, %35, %cst_23 {dimension_numbers = #tpu.dot_dimension_numbers<[1], [0], [0], [1], [0, 0, 1, 1], [], []>} : vector<64x128xbf16>, vector<128x64xbf16>, vector<64x64xf32> -> vector<64x64xf32>
      %cst_24 = arith.constant 0.000000e+00 : f32
      %43 = vector.broadcast %cst_24 : f32 to vector<64x64xf32>
      %44 = arith.cmpf ogt, %42, %43 : vector<64x64xf32>
      %45 = arith.extui %44 : vector<64x64xi1> to vector<64x64xi32>
      %46 = arith.sitofp %45 : vector<64x64xi32> to vector<64x64xf32>
      %47 = arith.truncf %46 : vector<64x64xf32> to vector<64x64xbf16>
      %c1_25 = arith.constant 1 : index
      %c0_26 = arith.constant 0 : index
      %c0_27 = arith.constant 0 : index
      %48 = vector.load %arg9[%c1_25, %c0_26, %c0_27] : memref<4x128x128xbf16, #tpu.memory_space<vmem>>, vector<1x128x64xbf16>
      %49 = vector.shape_cast %48 : vector<1x128x64xbf16> to vector<128x64xbf16>
      %cst_28 = arith.constant dense<0.000000e+00> : vector<128x64xf32>
      %50 = tpu.matmul %49, %47, %cst_28 {dimension_numbers = #tpu.dot_dimension_numbers<[1], [0], [0], [1], [0, 0, 1, 1], [], []>} : vector<128x64xbf16>, vector<64x64xbf16>, vector<128x64xf32> -> vector<128x64xf32>
      %cst_29 = arith.constant 1.000000e+00 : f32
      %51 = vector.broadcast %cst_29 : f32 to vector<1x64xf32>
      %cst_30 = arith.constant dense<0.000000e+00> : vector<1x128xf32>
      %52 = tpu.matmul %51, %50, %cst_30 {dimension_numbers = #tpu.dot_dimension_numbers<[1], [1], [0], [0], [0, 0, 1, 0], [], []>} : vector<1x64xf32>, vector<128x64xf32>, vector<1x128xf32> -> vector<1x128xf32>
      %53 = arith.addf %31, %52 : vector<1x128xf32>
      %c1_31 = arith.constant 1 : index
      %c0_32 = arith.constant 0 : index
      %c0_33 = arith.constant 0 : index
      %54 = vector.load %arg7[%c1_31, %c0_32, %c0_33] : memref<3x64x128xbf16, #tpu.memory_space<vmem>>, vector<1x32x64xbf16>
      %55 = vector.shape_cast %54 : vector<1x32x64xbf16> to vector<32x64xbf16>
      %c1_34 = arith.constant 1 : index
      %c0_35 = arith.constant 0 : index
      %c0_36 = arith.constant 0 : index
      %56 = vector.load %arg8[%c1_34, %c0_35, %c0_36] : memref<3x128x64xbf16, #tpu.memory_space<vmem>>, vector<1x64x32xbf16>
      %57 = vector.shape_cast %56 : vector<1x64x32xbf16> to vector<64x32xbf16>
      %cst_37 = arith.constant dense<0.000000e+00> : vector<32x64xf32>
      %58 = tpu.matmul %55, %47, %cst_37 {dimension_numbers = #tpu.dot_dimension_numbers<[1], [0], [0], [1], [0, 0, 1, 1], [], []>} : vector<32x64xbf16>, vector<64x64xbf16>, vector<32x64xf32> -> vector<32x64xf32>
      %cst_38 = arith.constant 0.000000e+00 : f32
      %59 = vector.broadcast %cst_38 : f32 to vector<32x64xf32>
      %60 = arith.cmpf ogt, %58, %59 : vector<32x64xf32>
      %61 = arith.extui %60 : vector<32x64xi1> to vector<32x64xi32>
      %62 = arith.sitofp %61 : vector<32x64xi32> to vector<32x64xf32>
      %63 = arith.truncf %62 : vector<32x64xf32> to vector<32x64xbf16>
      %cst_39 = arith.constant dense<0.000000e+00> : vector<32x32xf32>
      %64 = tpu.matmul %63, %57, %cst_39 {dimension_numbers = #tpu.dot_dimension_numbers<[1], [0], [0], [1], [0, 0, 1, 1], [], []>} : vector<32x64xbf16>, vector<64x32xbf16>, vector<32x32xf32> -> vector<32x32xf32>
      %cst_40 = arith.constant 0.000000e+00 : f32
      %65 = vector.broadcast %cst_40 : f32 to vector<32x32xf32>
      %66 = arith.cmpf ogt, %64, %65 : vector<32x32xf32>
      %67 = arith.extui %66 : vector<32x32xi1> to vector<32x32xi32>
      %68 = arith.sitofp %67 : vector<32x32xi32> to vector<32x32xf32>
      %69 = arith.truncf %68 : vector<32x32xf32> to vector<32x32xbf16>
      %c2 = arith.constant 2 : index
      %c0_41 = arith.constant 0 : index
      %c0_42 = arith.constant 0 : index
      %70 = vector.load %arg9[%c2, %c0_41, %c0_42] : memref<4x128x128xbf16, #tpu.memory_space<vmem>>, vector<1x128x32xbf16>
      %71 = vector.shape_cast %70 : vector<1x128x32xbf16> to vector<128x32xbf16>
      %cst_43 = arith.constant dense<0.000000e+00> : vector<128x32xf32>
      %72 = tpu.matmul %71, %69, %cst_43 {dimension_numbers = #tpu.dot_dimension_numbers<[1], [0], [0], [1], [0, 0, 1, 1], [], []>} : vector<128x32xbf16>, vector<32x32xbf16>, vector<128x32xf32> -> vector<128x32xf32>
      %cst_44 = arith.constant 1.000000e+00 : f32
      %73 = vector.broadcast %cst_44 : f32 to vector<1x32xf32>
      %cst_45 = arith.constant dense<0.000000e+00> : vector<1x128xf32>
      %74 = tpu.matmul %73, %72, %cst_45 {dimension_numbers = #tpu.dot_dimension_numbers<[1], [1], [0], [0], [0, 0, 1, 0], [], []>} : vector<1x32xf32>, vector<128x32xf32>, vector<1x128xf32> -> vector<1x128xf32>
      %75 = arith.addf %53, %74 : vector<1x128xf32>
      %c2_46 = arith.constant 2 : index
      %c0_47 = arith.constant 0 : index
      %c0_48 = arith.constant 0 : index
      %76 = vector.load %arg7[%c2_46, %c0_47, %c0_48] : memref<3x64x128xbf16, #tpu.memory_space<vmem>>, vector<1x16x32xbf16>
      %77 = vector.shape_cast %76 : vector<1x16x32xbf16> to vector<16x32xbf16>
      %c2_49 = arith.constant 2 : index
      %c0_50 = arith.constant 0 : index
      %c0_51 = arith.constant 0 : index
      %78 = vector.load %arg8[%c2_49, %c0_50, %c0_51] : memref<3x128x64xbf16, #tpu.memory_space<vmem>>, vector<1x32x16xbf16>
      %79 = vector.shape_cast %78 : vector<1x32x16xbf16> to vector<32x16xbf16>
      %cst_52 = arith.constant dense<0.000000e+00> : vector<16x32xf32>
      %80 = tpu.matmul %77, %69, %cst_52 {dimension_numbers = #tpu.dot_dimension_numbers<[1], [0], [0], [1], [0, 0, 1, 1], [], []>} : vector<16x32xbf16>, vector<32x32xbf16>, vector<16x32xf32> -> vector<16x32xf32>
      %cst_53 = arith.constant 0.000000e+00 : f32
      %81 = vector.broadcast %cst_53 : f32 to vector<16x32xf32>
      %82 = arith.cmpf ogt, %80, %81 : vector<16x32xf32>
      %83 = arith.extui %82 : vector<16x32xi1> to vector<16x32xi32>
      %84 = arith.sitofp %83 : vector<16x32xi32> to vector<16x32xf32>
      %85 = arith.truncf %84 : vector<16x32xf32> to vector<16x32xbf16>
      %cst_54 = arith.constant dense<0.000000e+00> : vector<16x16xf32>
      %86 = tpu.matmul %85, %79, %cst_54 {dimension_numbers = #tpu.dot_dimension_numbers<[1], [0], [0], [1], [0, 0, 1, 1], [], []>} : vector<16x32xbf16>, vector<32x16xbf16>, vector<16x16xf32> -> vector<16x16xf32>
      %cst_55 = arith.constant 0.000000e+00 : f32
      %87 = vector.broadcast %cst_55 : f32 to vector<16x16xf32>
      %88 = arith.cmpf ogt, %86, %87 : vector<16x16xf32>
      %89 = arith.extui %88 : vector<16x16xi1> to vector<16x16xi32>
      %90 = arith.sitofp %89 : vector<16x16xi32> to vector<16x16xf32>
      %91 = arith.truncf %90 : vector<16x16xf32> to vector<16x16xbf16>
      %c3 = arith.constant 3 : index
      %c0_56 = arith.constant 0 : index
      %c0_57 = arith.constant 0 : index
      %92 = vector.load %arg9[%c3, %c0_56, %c0_57] : memref<4x128x128xbf16, #tpu.memory_space<vmem>>, vector<1x128x16xbf16>
      %93 = vector.shape_cast %92 : vector<1x128x16xbf16> to vector<128x16xbf16>
      %cst_58 = arith.constant dense<0.000000e+00> : vector<128x16xf32>
      %94 = tpu.matmul %93, %91, %cst_58 {dimension_numbers = #tpu.dot_dimension_numbers<[1], [0], [0], [1], [0, 0, 1, 1], [], []>} : vector<128x16xbf16>, vector<16x16xbf16>, vector<128x16xf32> -> vector<128x16xf32>
      %cst_59 = arith.constant 1.000000e+00 : f32
      %95 = vector.broadcast %cst_59 : f32 to vector<1x16xf32>
      %cst_60 = arith.constant dense<0.000000e+00> : vector<1x128xf32>
      %96 = tpu.matmul %95, %94, %cst_60 {dimension_numbers = #tpu.dot_dimension_numbers<[1], [1], [0], [0], [0, 0, 1, 0], [], []>} : vector<1x16xf32>, vector<128x16xf32>, vector<1x128xf32> -> vector<1x128xf32>
      %97 = arith.addf %75, %96 : vector<1x128xf32>
      %98 = vector.shape_cast %97 : vector<1x128xf32> to vector<1x1x128xf32>
      %c0_61 = arith.constant 0 : index
      %c0_62 = arith.constant 0 : index
      %c0_63 = arith.constant 0 : index
      %99 = vector.load %arg10[%c0_61, %c0_62, %c0_63] : memref<1x1x128xf32, #tpu.memory_space<vmem>>, vector<1x1x128xf32>
      tpu.vector_store %arg10[%c0_61, %c0_62, %c0_63], %98 {strides = array<i32>} : memref<1x1x128xf32, #tpu.memory_space<vmem>>, vector<1x1x128xf32>,
    } else {
    }
    return
  }
  func.func @transform_0(%arg0: i32, %arg1: i32) -> (i32, i32) {
    %c0_i32 = arith.constant 0 : i32
    %c0_i32_0 = arith.constant 0 : i32
    %c0_i32_1 = arith.constant 0 : i32
    return %c0_i32, %c0_i32_0 : i32, i32
  }
  func.func @transform_1(%arg0: i32, %arg1: i32) -> (i32, i32) {
    %c0_i32 = arith.constant 0 : i32
    %c0_i32_0 = arith.constant 0 : i32
    %c0_i32_1 = arith.constant 0 : i32
    return %c0_i32, %c0_i32_0 : i32, i32
  }
  func.func @transform_2(%arg0: i32, %arg1: i32) -> i32 {
    %c0_i32 = arith.constant 0 : i32
    %c0_i32_0 = arith.constant 0 : i32
    return %c0_i32 : i32
  }
  func.func @transform_3(%arg0: i32, %arg1: i32) -> (i32, i32) {
    %c0_i32 = arith.constant 0 : i32
    %c0_i32_0 = arith.constant 0 : i32
    return %c0_i32, %arg1 : i32, i32
  }
  func.func @transform_4(%arg0: i32, %arg1: i32) -> (i32, i32) {
    %c0_i32 = arith.constant 0 : i32
    %c0_i32_0 = arith.constant 0 : i32
    return %c0_i32, %arg1 : i32, i32
  }
  func.func @transform_5(%arg0: i32, %arg1: i32) -> (i32, i32, i32) {
    %c0_i32 = arith.constant 0 : i32
    %c0_i32_0 = arith.constant 0 : i32
    %c0_i32_1 = arith.constant 0 : i32
    %c0_i32_2 = arith.constant 0 : i32
    return %c0_i32, %c0_i32_0, %c0_i32_1 : i32, i32, i32
  }
  func.func @transform_6(%arg0: i32, %arg1: i32) -> (i32, i32, i32) {
    %c0_i32 = arith.constant 0 : i32
    %c0_i32_0 = arith.constant 0 : i32
    %c0_i32_1 = arith.constant 0 : i32
    %c0_i32_2 = arith.constant 0 : i32
    return %c0_i32, %c0_i32_0, %c0_i32_1 : i32, i32, i32
  }
  func.func @transform_7(%arg0: i32, %arg1: i32) -> (i32, i32, i32) {
    %c0_i32 = arith.constant 0 : i32
    %c0_i32_0 = arith.constant 0 : i32
    %c0_i32_1 = arith.constant 0 : i32
    %c0_i32_2 = arith.constant 0 : i32
    return %c0_i32, %c0_i32_0, %c0_i32_1 : i32, i32, i32
  }
  func.func @transform_8(%arg0: i32, %arg1: i32) -> (i32, i32, i32) {
    %c0_i32 = arith.constant 0 : i32
    %c0_i32_0 = arith.constant 0 : i32
    %c0_i32_1 = arith.constant 0 : i32
    return %arg0, %c0_i32, %c0_i32_0 : i32, i32, i32
  }
}

</mosaic_0001>

<bundles_post_ra>
// kernel: tpu_custom_call.1
= control target key start
LH: loop header
LB: loop body
LE: loop exit
PB: predicated region body
PF: predicated region fallthrough
CT: control target
= control target key end

     0   :  { %s4985_s0 = inlined_call_operand.vmem [shape: f32[2,2], index: 0, kind: input, shape index: {}]   ;;  %s4986_s1 = inlined_call_operand.vmem [shape: f32[2,2], index: 1, kind: input, shape index: {}]   ;;  %s4987_s2 = inlined_call_operand.vmem [shape: s32[4], index: 2, kind: input, shape index: {}]   ;;  %s4988_s3 = inlined_call_operand.vmem [shape: f32[1,512], index: 3, kind: input, shape index: {}]   ;;  %s4989_s4 = inlined_call_operand.vmem [shape: f32[1,512], index: 4, kind: input, shape index: {}]   ;;  %s4990_s5 = inlined_call_operand.hbm [shape: bf16[3,64,128], index: 5, kind: input, shape index: {}]   ;;  %s4991_s6 = inlined_call_operand.vmem [shape: bf16[3,128,64], index: 6, kind: input, shape index: {}]   ;;  %s4992_s7 = inlined_call_operand.vmem [shape: bf16[4,128,128], index: 7, kind: input, shape index: {}]   ;;  %s4993_s8 = inlined_call_operand.hbm [shape: f32[2,1,128], index: 8, kind: output, shape index: {}]  }
   0x1   :  { %5002 = sst [smem:[#allocation20_spill]] %s4985_s0 }
   0x2   :  { %5003 = sst [smem:[#allocation21_spill]] %s4986_s1 }
   0x3   :  { %13 = vsyncpa [#allocation6], 0 }
   0x4   :  { %14 = vsyncpa [#allocation8], 0 }
   0x5   :  { %15 = vsyncpa [#allocation4], 0 }
   0x6   :  { %16 = vsyncpa [#allocation5], 0 }
   0x7   :  { %18 = vsyncpa [#allocation5 + $0x1], 0  ;;  %s4113_s27 = smov 0   ;;  %s4115_s28 = smov 0  }
   0x8   :  { %s4117_s29 = smov 0   ;;  %s4119_s30 = smov 0  }
   0x9   :  { %s4121_s9 = smov 0   ;;  %s4123_s10 = smov 0  }
   0xa   :  { %s4125_s11 = smov 0   ;;  %s4127_s12 = smov 0  }
   0xb LB: > { %5004 = sst [smem:[#allocation16_spill]] %s4044_s10  ;;  %s2636_s13 = sadd.s32 4294967295, %s4052_s12   ;;  %s4052_s12 = sphi %s4127_s12, %s24_s12   ;;  %s4048_s11 = sphi %s4125_s11, %s5046_s11   ;;  %s4044_s10 = sphi %s4123_s10, %s5045_s10   ;;  %s4040_s9 = sphi %s4121_s9, %s5044_s9   ;;  %s4036_s30 = sphi %s4119_s30, %s5043_s30   ;;  %s4032_s29 = sphi %s4117_s29, %s5049_s29   ;;  %s4028_s28 = sphi %s4115_s28, %s5048_s28   ;;  %s4024_s27 = sphi %s4113_s27, %s5047_s27  }
   0xc   : > { %5005 = sst [smem:[#allocation17_spill]] %s4048_s11  ;;  %s2637_s14 = sadd.s32 4294967294, %s4052_s12  }
   0xd   : > { %s33_s15 = sadd.s32 1, %s4044_s10  ;;  %s36_s16 = sadd.s32 1, %s4048_s11 }
   0xe   : > { %p34_p0 = scmp.ge.s32.totalorder %s33_s15, 4  ;;  %s221_s17 = sadd.s32 1, %s4032_s29 }
   0xf   : > { %p231_p1 = scmp.ne.s32.totalorder %s4032_s29, %s4028_s28  ;;  %p232_p2 = scmp.eq.s32.totalorder %s2636_s13, 7 }
  0x10   : > { %s5051_s15 = smov (%p34_p0, %s33_s15), 0  ;;  %s5053_s16 = smov (!%p34_p0, %s36_s16), %s4048_s11 }
  0x11   : > { %5006 = sst [smem:[#allocation18_spill]] %s5051_s15  ;;  %p4163_p3 = por %p232_p2, %p231_p1 }
  0x12   : > { %p237_p4 = scmp.ne.s32.totalorder %s4028_s28, %s4024_s27  ;;  %p38_p5 = scmp.ge.s32.totalorder %s5053_s16, 2 }
  0x13   : > { %s5007_s18 = scalar_select %p4163_p3, 1, 0 }
  0x14   : > { %p238_p6 = scmp.eq.s32.totalorder %s2637_s14, 7  ;;  %p2638_p7 = scmp.ge.s32.totalorder %s4052_s12, 1 }
  0x15   : > { %p245_p8 = scmp.lt.s32.totalorder %s4052_s12, 9  ;;  %s5055_s16 = smov (%p38_p5, %s5053_s16), 0 }
  0x16   : > { %5008 = sst [smem:[#allocation19_spill]] %s5055_s16  ;;  %p4173_p9 = por %p238_p6, %p237_p4 }
  0x17   : > { %p4177_p10 = pnand %p2638_p7, %p245_p8  ;;  %s218_s21 = ssub.s32 %s4048_s11, %s5055_s16 }
  0x18   : > { %s5009_s19 = scalar_select %p4173_p9, 1, 0 }
  0x19   : > { %s5010_s20 = scalar_select %p4177_p10, 1, 0 }
  0x1a   : > { %p219_p11 = scmp.eq.s32.totalorder %s218_s21, 0  ;;  %p3713_p12 = pneg %p4177_p10 }
  0x1b   : > { %p4185_p13 = scmp.eq.s32.totalorder %s2636_s13, 0  ;;  %s5012_s1 = sld [smem:[#allocation21_spill]] }
  0x1c   : > { %s4193_s26 = scalar_select %p219_p11, %s4032_s29, %s221_s17  }
  0x1d   : > { %s5011_s22 = scalar_select %p4185_p13, 1, 0 }
  0x1e   : > { %p4197_p0 = pnand %p4185_p13, %p3713_p12 }
  0x20   : > { %p4203_p2 = pneg %p4197_p0 }
  0x21   : > { %s269_s25 = sshll.u32 %s5012_s1, 4  ;;  %s270_s25 = int_to_ptr.vmem [resolvable:$true] %s269_s25 }
  0x22   : > { %s3873_s21 = scalar_lea.vmem %s270_s25, 32  ;;  %p3881_p6 = scmp.lt.s32.totalorder %s270_s25, %s270_s25 }
  0x23   : > { %p3874_p1 = scmp.ne.s32.totalorder %s270_s25, %s3873_s21  ;;  %p3882_p7 = scmp.lt.s32.totalorder %s3873_s21, %s3873_s21 }
  0x25   : > { %p3876_p4 = pnand %p4203_p2, %p3874_p1  ;;  %p3883_p8 = por %p3882_p7, %p3881_p6 }
  0x27   : > { %p3877_p5 = pneg %p3876_p4 }
  0x29   : > { %p3884_p11 = pnand %p3883_p8, %p3877_p5 }
  0x2b   : > { %3887 = shalt.err (!%p3884_p11)
}
  0x2c   : > { %s4054_s17 = smov [#allocation7]   ;;  %s5015_s0 = sld [smem:[#allocation20_spill]] }
  0x2d   : > { %3719 = dma.vmem_to_smem (!%p4197_p0), %s270_s25, 32, %s4054_s17, [#allocation8]  }
  0x2e   : > { %s280_s11 = sshll.u32 %s4987_s2, 4  ;;  %s281_s11 = int_to_ptr.vmem [resolvable:$true] %s280_s11 }
  0x32   : > { %s258_s1 = sshll.u32 %s5015_s0, 4  ;;  %s259_s1 = int_to_ptr.vmem [resolvable:$true] %s258_s1 }
  0x33   : > { %s3888_s10 = scalar_lea.vmem %s259_s1, 32  ;;  %p3896_p5 = scmp.lt.s32.totalorder %s259_s1, %s259_s1 }
  0x34   : > { %p3889_p12 = scmp.ne.s32.totalorder %s259_s1, %s3888_s10  ;;  %p3897_p6 = scmp.lt.s32.totalorder %s3888_s10, %s3888_s10 }
  0x36   : > { %p3891_p1 = pnand %p3889_p12, %p4203_p2  ;;  %p3898_p7 = por %p3897_p6, %p3896_p5 }
  0x38   : > { %p3892_p4 = pneg %p3891_p1 }
  0x3a   : > { %p3899_p8 = pnand %p3898_p7, %p3892_p4 }
  0x3c   : > { %3902 = shalt.err (!%p3899_p8)
}
  0x3d   : > { %s4055_s25 = smov [#allocation3]   ;;  %s3903_s21 = scalar_lea.vmem %s281_s11, 16 }
  0x3e   : > { %3716 = dma.vmem_to_smem (!%p4197_p0), %s259_s1, 32, %s4055_s25, [#allocation6]  }
  0x3f   : > { %p3904_p11 = scmp.ne.s32.totalorder %s281_s11, %s3903_s21  ;;  %p3911_p13 = scmp.lt.s32.totalorder %s281_s11, %s281_s11 }
  0x40   : > { %p3912_p10 = scmp.lt.s32.totalorder %s3903_s21, %s3903_s21 }
  0x41   : > { %p3906_p9 = pnand %p3904_p11, %p4203_p2 }
  0x42   : > { %p3913_p12 = por %p3912_p10, %p3911_p13 }
  0x43   : > { %p3907_p3 = pneg %p3906_p9 }
  0x45   : > { %p3914_p1 = pnand %p3913_p12, %p3907_p3 }
  0x47   : > { %3917 = shalt.err (!%p3914_p1)
}
  0x48   : > { %s4056_s10 = smov [#allocation9]   ;;  %s4057_s15 = smov [#allocation10]  }
  0x49   : > { %3722 = dma.vmem_to_smem (!%p4197_p0), %s281_s11, 16, %s4056_s10, [#allocation8]  }
  0x4a   : > { %s290_s16 = sshll.u32 %s4057_s15, 4  ;;  %s3918_s23 = scalar_lea.hbm %s4990_s5, 1536  ;;  %s291_s16 = int_to_ptr.vmem [resolvable:$true] %s290_s16 }
  0x4b   : > { %p3919_p9 = scmp.ne.s32.totalorder %s4990_s5, %s3918_s23  ;;  %p3925_p13 = scmp.lt.u32.totalorder %s3918_s23, %s4990_s5 }
  0x4d   : > { %p3921_p10 = pnand %p3919_p9, %p4203_p2 }
  0x4f   : > { %p3922_p3 = pneg %p3921_p10 }
  0x51   : > { %p3927_p4 = pnand %p3925_p13, %p3922_p3 }
  0x53   : > { %3930 = shalt.err (!%p3927_p4)
}
  0x54   : > { %s3931_s11 = scalar_lea.vmem %s291_s16, 1536  ;;  %p3939_p8 = scmp.lt.s32.totalorder %s291_s16, %s291_s16 }
  0x55   : > { %p3932_p5 = scmp.ne.s32.totalorder %s291_s16, %s3931_s11  ;;  %p3940_p11 = scmp.lt.s32.totalorder %s3931_s11, %s3931_s11 }
  0x57   : > { %p3934_p6 = pnand %p3932_p5, %p4203_p2  ;;  %p3941_p12 = por %p3940_p11, %p3939_p8 }
  0x59   : > { %p3935_p7 = pneg %p3934_p6 }
  0x5b   : > { %p3942_p1 = pnand %p3941_p12, %p3935_p7 }
  0x5d   : > { %3945 = shalt.err (!%p3942_p1)
}
  0x5e   : > { %s4058_s10 = smov 64   ;;  %s4059_s15 = smov 4  }
  0x5f   : > { %3725 = dma.hbm_to_vmem [thread:$0]  (!%p4197_p0), %s4990_s5, 1536, %s291_s16, [#allocation4], %s4058_s10, %s4058_s10, %s4059_s15  }
  0x60   : > { %p5016_p9 = scmp.ne.s32.totalorder %s5010_s20, 0 }
  0x61   : > { %p5017_p10 = scmp.ne.s32.totalorder (!%p5016_p9), %s5011_s22, 0 }
  0x62   : > { %324 = sbr.rel (%p5016_p9) target bundleno = 2624 (0xa40), region = 52 }
  0x69   : > { %4007 = dma.done.wait (%p5017_p10), [#allocation6], 32  }
  0x6a   : > { %4009 = vsyncadd (%p5017_p10), [#allocation6], 4294967264 }
  0x6b   : > { %4011 = dma.done.wait (%p5017_p10), [#allocation8], 48  }
  0x6c   : > { %4013 = vsyncadd (%p5017_p10), [#allocation8], 4294967248 }
  0x6d   : > { %4015 = dma.done.wait (%p5017_p10), [#allocation4], 1536  }
  0x6e   : > { %4017 = vsyncadd (%p5017_p10), [#allocation4], 4294965760 }
  0x6f   : > { %342 = sfence }
  0x70   : > { %s5001_s20 = sand.u32 1, %s4028_s28   ;;  %p371_p0 = scmp.lt.s32.totalorder %s4036_s30, 3 }
  0x71   : > { %s4272_s25 = scalar_lea.vmem [#allocation11], %s5001_s20  ;;  %p2649_p2 = scmp.ne.s32.totalorder %s4036_s30, 0 }
  0x72   : > { %s4260_s14 = scalar_select %p371_p0, %s4036_s30, 3 }
  0x73   : > { %381 = sbr.rel (%p2649_p2) target bundleno = 124 (0x7c), region = 72  ;;  %v4060_v0 = vmov (!%p2649_p2), 0.0  }
  0x74   : > { %s373_s17 = scalar_lea.vmem %s4988_s3, %s4260_s14  ;;  %s376_s22 = scalar_lea.vmem %s4989_s4, %s4260_s14  ;;  %382 = vst [vmem:[#allocation2] sm:$0xff] (!%p2649_p2), %v4060_v0  ;;  %383 = vst [vmem:[#allocation2 + $0x8] sm:$0xff] (!%p2649_p2), %v4060_v0 }
  0x75   : > { %384 = vst [vmem:[#allocation2 + $0x10] sm:$0xff] (!%p2649_p2), %v4060_v0  ;;  %385 = vst [vmem:[#allocation2 + $0x18] sm:$0xff] (!%p2649_p2), %v4060_v0 }
  0x76   : > { %386 = vst [vmem:[#allocation2 + $0x20] sm:$0xff] (!%p2649_p2), %v4060_v0  ;;  %387 = vst [vmem:[#allocation2 + $0x28] sm:$0xff] (!%p2649_p2), %v4060_v0 }
  0x77   : > { %388 = vst [vmem:[#allocation2 + $0x30] sm:$0xff] (!%p2649_p2), %v4060_v0  ;;  %389 = vst [vmem:[#allocation2 + $0x38] sm:$0xff] (!%p2649_p2), %v4060_v0 }
  0x78   : > { %390 = vst [vmem:[#allocation2 + $0x40] sm:$0xff] (!%p2649_p2), %v4060_v0  ;;  %391 = vst [vmem:[#allocation2 + $0x48] sm:$0xff] (!%p2649_p2), %v4060_v0 }
  0x79   : > { %392 = vst [vmem:[#allocation2 + $0x50] sm:$0xff] (!%p2649_p2), %v4060_v0  ;;  %393 = vst [vmem:[#allocation2 + $0x58] sm:$0xff] (!%p2649_p2), %v4060_v0 }
  0x7a   : > { %394 = vst [vmem:[#allocation2 + $0x60] sm:$0xff] %v4060_v0  ;;  %395 = vst [vmem:[#allocation2 + $0x68] sm:$0xff] %v4060_v0 }
  0x7b   : > { %396 = vst [vmem:[#allocation2 + $0x70] sm:$0xff] %v4060_v0  ;;  %397 = vst [vmem:[#allocation2 + $0x78] sm:$0xff] %v4060_v0 }
  0x7c PF: > { %s2650_s21 = sshll.u32 %s4040_s9, 7  ;;  %s404_s11 = sld [smem:[#allocation9 + %s4036_s30]] }
  0x7d   : > { %s399_s10 = sld [smem:[#allocation3 + %s2650_s21]]  ;;  %s400_s15 = sadd.s32 1, %s2650_s21 }
  0x7e   : > { %s401_s1 = sld [smem:[#allocation3 + %s400_s15]] }
  0x7f   : > { %s402_s0 = sld [smem:[#allocation7 + %s2650_s21]] }
  0x80   : > { %s403_s13 = sld [smem:[#allocation7 + %s400_s15]] }
  0x82   : > { %p2651_p3 = scmp.le.s32.totalorder %s404_s11, 0 }
  0x83   : > { %v410_v3 = vld [vmem:[%s376_s22] sm:$0x1] (!%p2651_p3)  ;;  %v417_v4 = vstv (!%p2651_p3), %s399_s10  ;;  %v423_v5 = vlaneseq (!%p2651_p3)  ;;  %v4061_v26 = vmov (!%p2651_p3), 1.0|1.0   ;;  %v659_v39 = vld [vmem:[#allocation2 + $0x10] sm:$0xff] (!%p2651_p3)  ;;  %v660_v45 = vld [vmem:[#allocation2 + $0x18] sm:$0xff] (!%p2651_p3) }
  0x84   : > { %408 = sbr.rel (%p2651_p3) target bundleno = 445 (0x1bd), region = 76  ;;  %v409_v6 = vld [vmem:[%s373_s17] sm:$0x1] (!%p2651_p3)  ;;  %v411_v7 = vstv (!%p2651_p3), %s401_s1  ;;  %v418_v8 = vsub.f32 (!%p2651_p3), %v410_v3, %v417_v4  ;;  %v667_v40 = vld [vmem:[#allocation2 + $0x50] sm:$0xff] (!%p2651_p3)  ;;  %v668_v46 = vld [vmem:[#allocation2 + $0x58] sm:$0xff] (!%p2651_p3) }
  0x85   : > { %v419_v1 = vstv (!%p2651_p3), %s402_s0  ;;  %v412_v9 = vsub.f32 (!%p2651_p3), %v409_v6, %v411_v7  ;;  %v4287_v10 = vshrl.u32 (!%p2651_p3), %v423_v5, 7  ;;  %v657_v41 = vld [vmem:[#allocation2] sm:$0xff] (!%p2651_p3)  ;;  %v658_v51 = vld [vmem:[#allocation2 + $0x8] sm:$0xff] (!%p2651_p3)  ;;  %v663_v63 = vld [vmem:[#allocation2 + $0x30] sm:$0xff] (!%p2651_p3) }
  0x86   : > { %3816 = vrcp.f32 (!%p2651_p3), %v419_v1  ;;  %v413_v2 = vstv (!%p2651_p3), %s403_s13  ;;  %v665_v42 = vld [vmem:[#allocation2 + $0x40] sm:$0xff] (!%p2651_p3)  ;;  %v666_v52 = vld [vmem:[#allocation2 + $0x48] sm:$0xff] (!%p2651_p3)  ;;  %v671_v0 = vld [vmem:[#allocation2 + $0x70] sm:$0xff] (!%p2651_p3) }
  0x87   : > { %3818 = vrcp.f32 (!%p2651_p3), %v413_v2  ;;  %v442_v16 = vsub.s32 (!%p2651_p3), 0, %v4287_v10  ;;  %v425_v19 = vadd.s32 (!%p2651_p3), 8, %v4287_v10  ;;  %v4292_v20 = vadd.s32 (!%p2651_p3), 16, %v4287_v10  ;;  %v661_v1 = vld [vmem:[#allocation2 + $0x20] sm:$0xff] (!%p2651_p3)  ;;  %v664_v5 = vld [vmem:[#allocation2 + $0x38] sm:$0xff] (!%p2651_p3) }
  0x88   : > { %v4295_v21 = vadd.s32 (!%p2651_p3), 24, %v4287_v10  ;;  %v4307_v24 = vadd.s32 (!%p2651_p3), 32, %v4287_v10  ;;  %v4310_v25 = vadd.s32 (!%p2651_p3), 40, %v4287_v10  ;;  %v432_v29 = vadd.s32 (!%p2651_p3), 64, %v4287_v10  ;;  %v669_v2 = vld [vmem:[#allocation2 + $0x60] sm:$0xff] (!%p2651_p3)  ;;  %v672_v6 = vld [vmem:[#allocation2 + $0x78] sm:$0xff] (!%p2651_p3) }
  0x89   : > { %v433_v30 = vadd.s32 (!%p2651_p3), 72, %v4287_v10  ;;  %v4340_v31 = vadd.s32 (!%p2651_p3), 48, %v4287_v10  ;;  %v4343_v32 = vadd.s32 (!%p2651_p3), 56, %v4287_v10  ;;  %v434_v33 = vadd.s32 (!%p2651_p3), 80, %v4287_v10 }
  0x8a   : > { %v435_v34 = vadd.s32 (!%p2651_p3), 88, %v4287_v10  ;;  %v436_v35 = vadd.s32 (!%p2651_p3), 96, %v4287_v10  ;;  %v437_v36 = vadd.s32 (!%p2651_p3), 104, %v4287_v10  ;;  %v438_v37 = vadd.s32 (!%p2651_p3), 112, %v4287_v10 }
  0x8b   : > { %v439_v38 = vadd.s32 120, %v4287_v10 }
  0x90   : > { %v3817_v11 = vpop.eup %3816 }
  0x91   : > { %v3819_v12 = vpop.eup %3818  ;;  %v421_v13 = vmul.f32 %v3817_v11, %v418_v8  ;;  %v662_v11 = vld [vmem:[#allocation2 + $0x28] sm:$0xff] }
  0x92   : > { %v415_v14 = vmul.f32 %v3819_v12, %v412_v9  ;;  %v670_v12 = vld [vmem:[#allocation2 + $0x68] sm:$0xff] }
  0x93   : > { %v3693_v15 = vtrunc.f32 %v421_v13 }
  0x94   : > { %v3691_v17 = vtrunc.f32 %v415_v14 }
  0x95   : > { %v3694_v18 = vcvt.f32.s32 %v3693_v15 }
  0x96   : > { %v3692_v23 = vcvt.f32.s32 %v3691_v17 }
  0x97   : > { %v4297_v22 = vrot.slane %v3694_v18, %v442_v16 }
  0x98   : > { %v4318_v28 = vrot.slane %v3692_v23, %v442_v16 }
  0x99   : > { %vm504_vm0 = vcmp.eq.s32.totalorder %v4287_v10, %v4297_v22  ;;  %vm505_vm1 = vcmp.eq.s32.totalorder %v425_v19, %v4297_v22  ;;  %vm506_vm2 = vcmp.eq.s32.totalorder %v4292_v20, %v4297_v22  ;;  %vm507_vm3 = vcmp.eq.s32.totalorder %v4295_v21, %v4297_v22 }
  0x9a   : > { %vm2684_vm4 = vmpackc.low %vm505_vm1, %vm504_vm0  ;;  %vm508_vm6 = vcmp.eq.s32.totalorder %v4307_v24, %v4297_v22  ;;  %vm509_vm7 = vcmp.eq.s32.totalorder %v4310_v25, %v4297_v22  ;;  %vm444_vm8 = vcmp.eq.s32.totalorder %v4287_v10, %v4318_v28  ;;  %vm445_vm9 = vcmp.eq.s32.totalorder %v425_v19, %v4318_v28 }
  0x9b   : > { %3197 = vmatprep.subr.msk.bf16.mxu0 %vm2684_vm4, %v4061_v26  ;;  %3671 = vmatprep.subr.msk.bf16.mxu1 %vm2684_vm4, %v4061_v26  ;;  %vm4314_vm5 = vmpackc.low %vm507_vm3, %vm506_vm2  ;;  %vm452_vm10 = vcmp.eq.s32.totalorder %v432_v29, %v4318_v28  ;;  %vm453_vm11 = vcmp.eq.s32.totalorder %v433_v30, %v4318_v28  ;;  %vm510_vm15 = vcmp.eq.s32.totalorder %v4340_v31, %v4297_v22 }
  0x9c   : > { %3198 = vmatpush3.bf16.xpose.msk.msra.mxu0 %vm2684_vm4, %v4061_v26  ;;  %3679 = vmatpush3.bf16.xpose.msk.msra.mxu1 %vm2684_vm4, %v4061_v26  ;;  %vm2688_vm12 = vmpackc.low %vm509_vm7, %vm508_vm6  ;;  %vm511_vm0 = vcmp.eq.s32.totalorder %v4343_v32, %v4297_v22  ;;  %vm512_vm2 = vcmp.eq.s32.totalorder %v432_v29, %v4297_v22  ;;  %vm513_vm3 = vcmp.eq.s32.totalorder %v433_v30, %v4297_v22 }
  0x9d   : > { %3199 = vmatprep.subr.msk.bf16.mxu0 %vm4314_vm5, %v4061_v26  ;;  %3672 = vmatprep.subr.msk.bf16.mxu1 %vm4314_vm5, %v4061_v26  ;;  %vm2700_vm13 = vmpackc.low %vm445_vm9, %vm444_vm8  ;;  %vm515_vm6 = vcmp.eq.s32.totalorder %v435_v34, %v4297_v22  ;;  %vm516_vm8 = vcmp.eq.s32.totalorder %v436_v35, %v4297_v22  ;;  %vm517_vm9 = vcmp.eq.s32.totalorder %v437_v36, %v4297_v22 }
  0x9e   : > { %3213 = vmatprep.mubr.msk.bf16.mxu0 %vm2700_vm13, %v4061_v26  ;;  %vm2708_vm14 = vmpackc.low %vm453_vm11, %vm452_vm10  ;;  %vm518_vm11 = vcmp.eq.s32.totalorder %v438_v37, %v4297_v22 }
  0x9f   : > { %3221 = vmatprep.mubr.msk.bf16.mxu1 %vm2708_vm14, %v4061_v26  ;;  %vm2690_vm1 = vmpackc.low %vm511_vm0, %vm510_vm15  ;;  %vm446_vm14 = vcmp.eq.s32.totalorder %v4292_v20, %v4318_v28  ;;  %vm447_vm15 = vcmp.eq.s32.totalorder %v4295_v21, %v4318_v28  ;;  %vm454_vm0 = vcmp.eq.s32.totalorder %v434_v33, %v4318_v28 }
  0xa0   : > { %vm2692_vm4 = vmpackc.low %vm513_vm3, %vm512_vm2  ;;  %vm448_vm2 = vcmp.eq.s32.totalorder %v4307_v24, %v4318_v28  ;;  %vm449_vm3 = vcmp.eq.s32.totalorder %v4310_v25, %v4318_v28 }
  0xa1   : > { %vm2696_vm10 = vmpackc.low %vm517_vm9, %vm516_vm8 }
  0xa2   : > { %vm2704_vm8 = vmpackc.low %vm449_vm3, %vm448_vm2 }
  0xa4   : > { %3200 = vmatpush3.bf16.xpose.msk.msra.mxu0 %vm4314_vm5, %v4061_v26  ;;  %3680 = vmatpush3.bf16.xpose.msk.msra.mxu1 %vm4314_vm5, %v4061_v26  ;;  %vm514_vm5 = vcmp.eq.s32.totalorder %v434_v33, %v4297_v22 }
  0xa5   : > { %3201 = vmatprep.subr.msk.bf16.mxu0 %vm2688_vm12, %v4061_v26  ;;  %3673 = vmatprep.subr.msk.bf16.mxu1 %vm2688_vm12, %v4061_v26  ;;  %vm2694_vm7 = vmpackc.low %vm515_vm6, %vm514_vm5  ;;  %vm456_vm5 = vcmp.eq.s32.totalorder %v436_v35, %v4318_v28  ;;  %vm457_vm6 = vcmp.eq.s32.totalorder %v437_v36, %v4318_v28 }
  0xa6   : > { %vm2712_vm9 = vmpackc.low %vm457_vm6, %vm456_vm5 }
  0xac   : > { %3202 = vmatpush3.bf16.xpose.msk.msra.mxu0 %vm2688_vm12, %v4061_v26  ;;  %3681 = vmatpush3.bf16.xpose.msk.msra.mxu1 %vm2688_vm12, %v4061_v26  ;;  %vm519_vm12 = vcmp.eq.s32.totalorder %v439_v38, %v4297_v22 }
  0xad   : > { %3203 = vmatprep.subr.msk.bf16.mxu0 %vm2690_vm1, %v4061_v26  ;;  %3674 = vmatprep.subr.msk.bf16.mxu1 %vm2690_vm1, %v4061_v26  ;;  %vm2698_vm13 = vmpackc.low %vm519_vm12, %vm518_vm11  ;;  %vm451_vm11 = vcmp.eq.s32.totalorder %v4343_v32, %v4318_v28  ;;  %vm458_vm12 = vcmp.eq.s32.totalorder %v438_v37, %v4318_v28 }
  0xb4   : > { %3204 = vmatpush3.bf16.xpose.msk.msra.mxu0 %vm2690_vm1, %v4061_v26  ;;  %3682 = vmatpush3.bf16.xpose.msk.msra.mxu1 %vm2690_vm1, %v4061_v26  ;;  %vm455_vm1 = vcmp.eq.s32.totalorder %v435_v34, %v4318_v28 }
  0xb5   : > { %3205 = vmatprep.subr.msk.bf16.mxu0 %vm2692_vm4, %v4061_v26  ;;  %3675 = vmatprep.subr.msk.bf16.mxu1 %vm2692_vm4, %v4061_v26 }
  0xbc   : > { %3206 = vmatpush3.bf16.xpose.msk.msra.mxu0 %vm2692_vm4, %v4061_v26  ;;  %3683 = vmatpush3.bf16.xpose.msk.msra.mxu1 %vm2692_vm4, %v4061_v26  ;;  %vm2702_vm4 = vmpackc.low %vm447_vm15, %vm446_vm14 }
  0xbd   : > { %3207 = vmatprep.subr.msk.bf16.mxu0 %vm2694_vm7, %v4061_v26  ;;  %3676 = vmatprep.subr.msk.bf16.mxu1 %vm2694_vm7, %v4061_v26 }
  0xc4   : > { %3208 = vmatpush3.bf16.xpose.msk.msra.mxu0 %vm2694_vm7, %v4061_v26  ;;  %3684 = vmatpush3.bf16.xpose.msk.msra.mxu1 %vm2694_vm7, %v4061_v26  ;;  %vm2710_vm7 = vmpackc.low %vm455_vm1, %vm454_vm0 }
  0xc5   : > { %3209 = vmatprep.subr.msk.bf16.mxu0 %vm2696_vm10, %v4061_v26  ;;  %3677 = vmatprep.subr.msk.bf16.mxu1 %vm2696_vm10, %v4061_v26 }
  0xcc   : > { %3210 = vmatpush3.bf16.xpose.msk.msra.mxu0 %vm2696_vm10, %v4061_v26  ;;  %3685 = vmatpush3.bf16.xpose.msk.msra.mxu1 %vm2696_vm10, %v4061_v26  ;;  %vm450_vm10 = vcmp.eq.s32.totalorder %v4340_v31, %v4318_v28 }
  0xcd   : > { %3211 = vmatprep.subr.msk.bf16.mxu0 %vm2698_vm13, %v4061_v26  ;;  %3678 = vmatprep.subr.msk.bf16.mxu1 %vm2698_vm13, %v4061_v26  ;;  %vm2706_vm14 = vmpackc.low %vm451_vm11, %vm450_vm10 }
  0xd4   : > { %3212 = vmatpush3.bf16.xpose.msk.msra.mxu0 %vm2698_vm13, %v4061_v26  ;;  %3686 = vmatpush3.bf16.xpose.msk.msra.mxu1 %vm2698_vm13, %v4061_v26  ;;  %vm459_vm13 = vcmp.eq.s32.totalorder %v439_v38, %v4318_v28 }
  0xd5   : > { %vm2714_vm15 = vmpackc.low %vm459_vm13, %vm458_vm12 }
  0xdb   : > { %3214 = vmatmul.mubr.msk.bf16.vlgmr.msra.gmra.mrb[0].mxu0 %vm2702_vm4, %v4061_v26  ;;  %3222 = vmatmul.mubr.msk.bf16.vlgmr.msra.gmra.mrb[0].mxu1 %vm2710_vm7, %v4061_v26 }
  0xdc   : > { %3217 = vmatprep.mubr.msk.bf16.mxu0 %vm2704_vm8, %v4061_v26  ;;  %3225 = vmatprep.mubr.msk.bf16.mxu1 %vm2712_vm9, %v4061_v26 }
  0xe3   : > { %3218 = vmatmul.mubr.msk.bf16.gmra.mrb[4].mxu0 %vm2706_vm14, %v4061_v26  ;;  %3226 = vmatmul.mubr.msk.bf16.gmra.mrb[4].mxu1 %vm2714_vm15, %v4061_v26 }
 0x1ae   : > { %v3215_v43 = vpop.f32.mrb[0].mxu0  ;;  %v3223_v44 = vpop.f32.mrb[0].mxu1 }
 0x1af   : > { %v675_v47 = vadd.f32 %v3215_v43, %v659_v39  ;;  %v683_v48 = vadd.f32 %v3223_v44, %v667_v40  ;;  %v594_v49 = vpop.f32.mrb[1].mxu0  ;;  %v626_v50 = vpop.f32.mrb[1].mxu1 }
 0x1b0   : > { %v673_v53 = vadd.f32 %v657_v41, %v594_v49  ;;  %v681_v54 = vadd.f32 %v665_v42, %v626_v50  ;;  %v3216_v55 = vpop.f32.mrb[2].mxu0  ;;  %v3224_v56 = vpop.f32.mrb[2].mxu1 }
 0x1b1   : > { %691 = vst [vmem:[#allocation2 + $0x10] sm:$0xff] %v675_v47  ;;  %699 = vst [vmem:[#allocation2 + $0x50] sm:$0xff] %v683_v48  ;;  %v676_v57 = vadd.f32 %v3216_v55, %v660_v45  ;;  %v684_v58 = vadd.f32 %v3224_v56, %v668_v46  ;;  %v597_v59 = vpop.f32.mrb[3].mxu0  ;;  %v629_v60 = vpop.f32.mrb[3].mxu1 }
 0x1b2   : > { %689 = vst [vmem:[#allocation2] sm:$0xff] %v673_v53  ;;  %697 = vst [vmem:[#allocation2 + $0x40] sm:$0xff] %v681_v54  ;;  %v674_v61 = vadd.f32 %v658_v51, %v597_v59  ;;  %v682_v62 = vadd.f32 %v666_v52, %v629_v60 }
 0x1b3   : > { %692 = vst [vmem:[#allocation2 + $0x18] sm:$0xff] %v676_v57  ;;  %700 = vst [vmem:[#allocation2 + $0x58] sm:$0xff] %v684_v58 }
 0x1b4   : > { %690 = vst [vmem:[#allocation2 + $0x8] sm:$0xff] %v674_v61  ;;  %698 = vst [vmem:[#allocation2 + $0x48] sm:$0xff] %v682_v62 }
 0x1b6   : > { %v3219_v3 = vpop.f32.mrb[4].mxu0  ;;  %v3227_v4 = vpop.f32.mrb[4].mxu1 }
 0x1b7   : > { %v679_v7 = vadd.f32 %v3219_v3, %v663_v63  ;;  %v687_v8 = vadd.f32 %v3227_v4, %v671_v0  ;;  %v610_v9 = vpop.f32.mrb[5].mxu0  ;;  %v642_v10 = vpop.f32.mrb[5].mxu1 }
 0x1b8   : > { %v677_v13 = vadd.f32 %v661_v1, %v610_v9  ;;  %v685_v14 = vadd.f32 %v669_v2, %v642_v10  ;;  %v3220_v15 = vpop.f32.mrb[6].mxu0  ;;  %v3228_v16 = vpop.f32.mrb[6].mxu1 }
 0x1b9   : > { %695 = vst [vmem:[#allocation2 + $0x30] sm:$0xff] %v679_v7  ;;  %703 = vst [vmem:[#allocation2 + $0x70] sm:$0xff] %v687_v8  ;;  %v680_v17 = vadd.f32 %v3220_v15, %v664_v5  ;;  %v688_v18 = vadd.f32 %v3228_v16, %v672_v6  ;;  %v613_v19 = vpop.f32.mrb[7].mxu0  ;;  %v645_v20 = vpop.f32.mrb[7].mxu1 }
 0x1ba   : > { %693 = vst [vmem:[#allocation2 + $0x20] sm:$0xff] %v677_v13  ;;  %701 = vst [vmem:[#allocation2 + $0x60] sm:$0xff] %v685_v14  ;;  %v678_v21 = vadd.f32 %v662_v11, %v613_v19  ;;  %v686_v22 = vadd.f32 %v670_v12, %v645_v20 }
 0x1bb   : > { %696 = vst [vmem:[#allocation2 + $0x38] sm:$0xff] %v680_v17  ;;  %704 = vst [vmem:[#allocation2 + $0x78] sm:$0xff] %v688_v18 }
 0x1bc   : > { %694 = vst [vmem:[#allocation2 + $0x28] sm:$0xff] %v678_v21  ;;  %702 = vst [vmem:[#allocation2 + $0x68] sm:$0xff] %v686_v22 }
 0x1bd PF: > { %p2716_p13 = scmp.ne.s32.totalorder %s4036_s30, 3 }
 0x1be   : > { %v709_v23 = vld [vmem:[#allocation2] sm:$0xff] (!%p2716_p13)  ;;  %v710_v24 = vld [vmem:[#allocation2 + $0x8] sm:$0xff] (!%p2716_p13)  ;;  %v711_v25 = vld [vmem:[#allocation2 + $0x10] sm:$0xff] (!%p2716_p13)  ;;  %v4062_v29 = vmov (!%p2716_p13), 1.0|1.0  }
 0x1bf   : > { %708 = sbr.rel (%p2716_p13) target bundleno = 2598 (0xa26), region = 80  ;;  %vm725_vm0 = vcmp.gt.f32.partialorder (!%p2716_p13), %v709_v23, 0.0  ;;  %vm726_vm1 = vcmp.gt.f32.partialorder (!%p2716_p13), %v710_v24, 0.0  ;;  %v712_v26 = vld [vmem:[#allocation2 + $0x18] sm:$0xff] (!%p2716_p13)  ;;  %vm727_vm2 = vcmp.gt.f32.partialorder (!%p2716_p13), %v711_v25, 0.0  ;;  %v717_v34 = vld [vmem:[#allocation2 + $0x40] sm:$0xff] (!%p2716_p13) }
 0x1c0   : > { %vm2741_vm3 = vmpackc.low (!%p2716_p13), %vm726_vm1, %vm725_vm0  ;;  %vm728_vm4 = vcmp.gt.f32.partialorder (!%p2716_p13), %v712_v26, 0.0  ;;  %v715_v31 = vld [vmem:[#allocation2 + $0x30] sm:$0xff] (!%p2716_p13)  ;;  %v718_v35 = vld [vmem:[#allocation2 + $0x48] sm:$0xff] (!%p2716_p13)  ;;  %vm733_vm12 = vcmp.gt.f32.partialorder (!%p2716_p13), %v717_v34, 0.0 }
 0x1c1   : > { %v713_v27 = vld [vmem:[#allocation2 + $0x20] sm:$0xff] (!%p2716_p13)  ;;  %3261 = vmatprep.subr.msk.bf16.mxu1 (!%p2716_p13), %vm2741_vm3, %v4062_v29  ;;  %vm4421_vm5 = vmpackc.low (!%p2716_p13), %vm728_vm4, %vm727_vm2  ;;  %3229 = vmatprep.subr.msk.bf16.mxu0 (!%p2716_p13), %vm2741_vm3, %v4062_v29  ;;  %vm731_vm9 = vcmp.gt.f32.partialorder (!%p2716_p13), %v715_v31, 0.0  ;;  %v719_v37 = vld [vmem:[#allocation2 + $0x50] sm:$0xff] (!%p2716_p13)  ;;  %vm734_vm13 = vcmp.gt.f32.partialorder (!%p2716_p13), %v718_v35, 0.0 }
 0x1c2   : > { %vm729_vm6 = vcmp.gt.f32.partialorder (!%p2716_p13), %v713_v27, 0.0  ;;  %3262 = vmatpush3.bf16.msk.msra.mxu1 (!%p2716_p13), %vm2741_vm3, %v4062_v29  ;;  %v716_v32 = vld [vmem:[#allocation2 + $0x38] sm:$0xff] (!%p2716_p13)  ;;  %3230 = vmatpush3.bf16.msk.msra.mxu0 (!%p2716_p13), %vm2741_vm3, %v4062_v29  ;;  %v3820_v36 = vld [vmem:[#allocation10] sm:$0xff] (!%p2716_p13)   ;;  %vm4469_vm14 = vmpackc.low (!%p2716_p13), %vm734_vm13, %vm733_vm12  ;;  %vm735_vm15 = vcmp.gt.f32.partialorder (!%p2716_p13), %v719_v37, 0.0 }
 0x1c3   : > { %v714_v28 = vld [vmem:[#allocation2 + $0x28] sm:$0xff] (!%p2716_p13)  ;;  %3263 = vmatprep.subr.msk.bf16.mxu1 (!%p2716_p13), %vm4421_vm5, %v4062_v29  ;;  %3231 = vmatprep.subr.msk.bf16.mxu0 (!%p2716_p13), %vm4421_vm5, %v4062_v29  ;;  %vm732_vm10 = vcmp.gt.f32.partialorder (!%p2716_p13), %v716_v32, 0.0  ;;  %v720_v39 = vld [vmem:[#allocation2 + $0x58] sm:$0xff] (!%p2716_p13)  ;;  %v3824_v40 = vld [vmem:[%s4992_s7] sm:$0xff] (!%p2716_p13)  }
 0x1c4   : > { %vm730_vm7 = vcmp.gt.f32.partialorder (!%p2716_p13), %v714_v28, 0.0  ;;  %vm4450_vm11 = vmpackc.low (!%p2716_p13), %vm732_vm10, %vm731_vm9  ;;  %3277 = vmatprep.mubr.bf16.mxu1 (!%p2716_p13), %v3820_v36  ;;  %3245 = vmatprep.mubr.bf16.mxu0 (!%p2716_p13), %v3824_v40  ;;  %vm736_vm0 = vcmp.gt.f32.partialorder (!%p2716_p13), %v720_v39, 0.0  ;;  %v721_v42 = vld [vmem:[#allocation2 + $0x60] sm:$0xff] (!%p2716_p13)  ;;  %v722_v43 = vld [vmem:[#allocation2 + $0x68] sm:$0xff] (!%p2716_p13) }
 0x1c5   : > { %vm4434_vm8 = vmpackc.low (!%p2716_p13), %vm730_vm7, %vm729_vm6  ;;  %vm737_vm2 = vcmp.gt.f32.partialorder (!%p2716_p13), %v721_v42, 0.0  ;;  %vm738_vm3 = vcmp.gt.f32.partialorder (!%p2716_p13), %v722_v43, 0.0  ;;  %v723_v44 = vld [vmem:[#allocation2 + $0x70] sm:$0xff] (!%p2716_p13)  ;;  %v724_v45 = vld [vmem:[#allocation2 + $0x78] sm:$0xff] (!%p2716_p13) }
 0x1c6   : > { %3264 = vmatpush3.bf16.msk.msra.mxu1 %vm4421_vm5, %v4062_v29  ;;  %3232 = vmatpush3.bf16.msk.msra.mxu0 %vm4421_vm5, %v4062_v29  ;;  %vm2751_vm1 = vmpackc.low %vm736_vm0, %vm735_vm15  ;;  %vm739_vm5 = vcmp.gt.f32.partialorder %v723_v44, 0.0  ;;  %vm740_vm6 = vcmp.gt.f32.partialorder %v724_v45, 0.0  ;;  %v3826_v46 = vld [vmem:[%s4991_s6] sm:$0xff]   ;;  %v3821_v47 = vld [vmem:[#allocation10 + $0x8] sm:$0xff]  }
 0x1c7   : > { %3265 = vmatprep.subr.msk.bf16.mxu1 %vm4434_vm8, %v4062_v29  ;;  %3233 = vmatprep.subr.msk.bf16.mxu0 %vm4434_vm8, %v4062_v29  ;;  %vm2753_vm4 = vmpackc.low %vm738_vm3, %vm737_vm2  ;;  %v3825_v48 = vld [vmem:[%s4992_s7 + $0x8] sm:$0xff]   ;;  %v3822_v49 = vld [vmem:[#allocation10 + $0x10] sm:$0xff]  }
 0x1c8   : > { %vm2755_vm7 = vmpackc.low %vm740_vm6, %vm739_vm5  ;;  %v3827_v50 = vld [vmem:[%s4992_s7 + $0x10] sm:$0xff]   ;;  %v3828_v51 = vld [vmem:[%s4991_s6 + $0x8] sm:$0xff]  }
 0x1c9   : > { %v3830_v52 = vld [vmem:[%s4991_s6 + $0x10] sm:$0xff]   ;;  %v3823_v53 = vld [vmem:[#allocation10 + $0x18] sm:$0xff]   ;;  %v3831_v55 = vld [vmem:[%s4992_s7 + $0x20] sm:$0xff]  }
 0x1ca   : > { %3266 = vmatpush3.bf16.msk.msra.mxu1 %vm4434_vm8, %v4062_v29  ;;  %3234 = vmatpush3.bf16.msk.msra.mxu0 %vm4434_vm8, %v4062_v29  ;;  %v3829_v54 = vld [vmem:[%s4992_s7 + $0x18] sm:$0xff]   ;;  %v3834_v57 = vld [vmem:[%s4991_s6 + $0x20] sm:$0xff]   ;;  %v3833_v58 = vld [vmem:[%s4992_s7 + $0x28] sm:$0xff]  }
 0x1cb   : > { %3267 = vmatprep.subr.msk.bf16.mxu1 %vm4450_vm11, %v4062_v29  ;;  %3235 = vmatprep.subr.msk.bf16.mxu0 %vm4450_vm11, %v4062_v29  ;;  %v3832_v56 = vld [vmem:[%s4991_s6 + $0x18] sm:$0xff]   ;;  %v3835_v59 = vld [vmem:[%s4992_s7 + $0x30] sm:$0xff]   ;;  %v3836_v60 = vld [vmem:[%s4991_s6 + $0x28] sm:$0xff]  }
 0x1cc   : > { %v3838_v61 = vld [vmem:[%s4991_s6 + $0x30] sm:$0xff]   ;;  %v3837_v62 = vld [vmem:[%s4992_s7 + $0x38] sm:$0xff]   ;;  %v3840_v33 = vld [vmem:[%s4992_s7 + $0x40] sm:$0xff]  }
 0x1cd   : > { %v3839_v63 = vld [vmem:[%s4991_s6 + $0x38] sm:$0xff]   ;;  %v3841_v34 = vld [vmem:[#allocation10 + $0x20] sm:$0xff]   ;;  %v3842_v45 = vld [vmem:[%s4992_s7 + $0x48] sm:$0xff]  }
 0x1ce   : > { %3268 = vmatpush3.bf16.msk.msra.mxu1 %vm4450_vm11, %v4062_v29  ;;  %3236 = vmatpush3.bf16.msk.msra.mxu0 %vm4450_vm11, %v4062_v29  ;;  %v3850_v44 = vld [vmem:[%s4991_s6 + $0x40] sm:$0xff]  }
 0x1cf   : > { %3269 = vmatprep.subr.msk.bf16.mxu1 %vm4469_vm14, %v4062_v29  ;;  %3237 = vmatprep.subr.msk.bf16.mxu0 %vm4469_vm14, %v4062_v29 }
 0x1d2   : > { %3270 = vmatpush3.bf16.msk.msra.mxu1 %vm4469_vm14, %v4062_v29  ;;  %3238 = vmatpush3.bf16.msk.msra.mxu0 %vm4469_vm14, %v4062_v29 }
 0x1d3   : > { %3271 = vmatprep.subr.msk.bf16.mxu1 %vm2751_vm1, %v4062_v29  ;;  %3239 = vmatprep.subr.msk.bf16.mxu0 %vm2751_vm1, %v4062_v29 }
 0x1d6   : > { %3272 = vmatpush3.bf16.msk.msra.mxu1 %vm2751_vm1, %v4062_v29  ;;  %3240 = vmatpush3.bf16.msk.msra.mxu0 %vm2751_vm1, %v4062_v29 }
 0x1d7   : > { %3273 = vmatprep.subr.msk.bf16.mxu1 %vm2753_vm4, %v4062_v29  ;;  %3241 = vmatprep.subr.msk.bf16.mxu0 %vm2753_vm4, %v4062_v29 }
 0x1da   : > { %3274 = vmatpush3.bf16.msk.msra.mxu1 %vm2753_vm4, %v4062_v29  ;;  %3242 = vmatpush3.bf16.msk.msra.mxu0 %vm2753_vm4, %v4062_v29  ;;  %vm1281_vm4 = vcmask 523264  }
 0x1db   : > { %3275 = vmatprep.subr.msk.bf16.mxu1 %vm2755_vm7, %v4062_v29  ;;  %3243 = vmatprep.subr.msk.bf16.mxu0 %vm2755_vm7, %v4062_v29 }
 0x1de   : > { %3276 = vmatpush3.bf16.msk.msra.mxu1 %vm2755_vm7, %v4062_v29  ;;  %3244 = vmatpush3.bf16.msk.msra.mxu0 %vm2755_vm7, %v4062_v29 }
 0x1df   : > { %3285 = vmatprep.subr.bf16.mxu0 %v3826_v46 }
 0x1e1   : > { %3278 = vmatmul.mubr.bf16.vlgmr.msra.gmra.mrb[0].mxu1 %v3821_v47  ;;  %3246 = vmatmul.mubr.bf16.vlgmr.msra.gmra.mrb[0].mxu0 %v3825_v48  ;;  %v3844_v47 = vld [vmem:[%s4992_s7 + $0x50] sm:$0xff]   ;;  %v3851_v48 = vld [vmem:[%s4991_s6 + $0x48] sm:$0xff]  }
 0x1e2   : > { %3281 = vmatprep.mubr.bf16.mxu1 %v3822_v49  ;;  %3286 = vmatpush3.bf16.msra.mxu0 %v3826_v46  ;;  %v3843_v46 = vld [vmem:[#allocation10 + $0x28] sm:$0xff]   ;;  %v3845_v49 = vld [vmem:[%s4992_s7 + $0x58] sm:$0xff]  }
 0x1e3   : > { %3249 = vmatprep.mubr.bf16.mxu0 %v3827_v50  ;;  %3287 = vmatprep.subr.bf16.mxu0 %v3828_v51  ;;  %v3846_v50 = vld [vmem:[%s4992_s7 + $0x60] sm:$0xff]  }
 0x1e6   : > { %3288 = vmatpush3.bf16.msra.mxu0 %v3828_v51  ;;  %v3847_v51 = vld [vmem:[%s4992_s7 + $0x68] sm:$0xff]  }
 0x1e7   : > { %3289 = vmatprep.subr.bf16.mxu0 %v3830_v52 }
 0x1e9   : > { %3282 = vmatmul.mubr.bf16.gmra.mrb[4].mxu1 %v3823_v53  ;;  %3250 = vmatmul.mubr.bf16.gmra.mrb[4].mxu0 %v3829_v54  ;;  %v3849_v53 = vld [vmem:[%s4992_s7 + $0x78] sm:$0xff]   ;;  %v3852_v54 = vld [vmem:[%s4991_s6 + $0x50] sm:$0xff]  }
 0x1ea   : > { %3290 = vmatpush3.bf16.msra.mxu0 %v3830_v52  ;;  %3253 = vmatprep.mubr.bf16.mxu0 %v3831_v55  ;;  %v3848_v52 = vld [vmem:[%s4992_s7 + $0x70] sm:$0xff]   ;;  %v3853_v55 = vld [vmem:[%s4991_s6 + $0x58] sm:$0xff]  }
 0x1eb   : > { %3291 = vmatprep.subr.bf16.mxu0 %v3832_v56  ;;  %3317 = vmatprep.mubr.msk.bf16.mxu1 %vm1281_vm4, %v3840_v33 }
 0x1ee   : > { %3292 = vmatpush3.bf16.msra.mxu0 %v3832_v56  ;;  %v4063_v56 = vmov 0.0|0.0  }
 0x1ef   : > { %3293 = vmatprep.subr.bf16.mxu0 %v3834_v57 }
 0x1f1   : > { %3254 = vmatmul.mubr.bf16.gmra.mrb[8].mxu0 %v3833_v58 }
 0x1f2   : > { %3294 = vmatpush3.bf16.msra.mxu0 %v3834_v57  ;;  %3257 = vmatprep.mubr.bf16.mxu0 %v3835_v59  ;;  %v4065_v57 = vmov 0.0  }
 0x1f3   : > { %3295 = vmatprep.subr.bf16.mxu0 %v3836_v60 }
 0x1f6   : > { %3296 = vmatpush3.bf16.msra.mxu0 %v3836_v60 }
 0x1f7   : > { %3297 = vmatprep.subr.bf16.mxu0 %v3838_v61 }
 0x1f9   : > { %3258 = vmatmul.mubr.bf16.gmra.mrb[12].mxu0 %v3837_v62 }
 0x1fa   : > { %3298 = vmatpush3.bf16.msra.mxu0 %v3838_v61 }
 0x1fb   : > { %3299 = vmatprep.subr.bf16.mxu0 %v3839_v63 }
 0x1fe   : > { %3300 = vmatpush3.bf16.msra.mxu0 %v3839_v63 }
 0x2b4   : > { %v3279_v0 = vpop.f32.mrb[0].mxu1  ;;  %v4548_v1 = vpop.f32.mrb[0].mxu0 }
 0x2b5   : > { %v1024_v2 = vpop.f32.mrb[1].mxu1  ;;  %v4550_v3 = vpop.f32.mrb[1].mxu0  ;;  %vm1057_vm8 = vcmp.gt.f32.partialorder %v3279_v0, 0.0 }
 0x2b6   : > { %v3280_v4 = vpop.f32.mrb[2].mxu1  ;;  %v4552_v5 = vpop.f32.mrb[2].mxu0  ;;  %vm1055_vm10 = vcmp.gt.f32.partialorder %v1024_v2, 0.0 }
 0x2b7   : > { %vm1058_vm9 = vcmp.gt.f32.partialorder %v3280_v4, 0.0  ;;  %v1027_v6 = vpop.f32.mrb[3].mxu1  ;;  %v3587_v7 = vpack.c.bf16 %v4552_v5, %v4548_v1  ;;  %v4556_v8 = vpop.f32.mrb[3].mxu0  ;;  %v3854_v1 = vld [vmem:[%s4992_s7 + $0x80] sm:$0xff]  }
 0x2b8   : > { %vm2795_vm11 = vmpackc.low %vm1058_vm9, %vm1057_vm8  ;;  %vm1056_vm12 = vcmp.gt.f32.partialorder %v1027_v6, 0.0  ;;  %v3584_v9 = vpack.c.bf16 %v4556_v8, %v4550_v3 }
 0x2b9   : > { %vm2793_vm13 = vmpackc.low %vm1056_vm12, %vm1055_vm10 }
 0x2ba   : > { %3301 = vmatprep.mubr.msk.bf16.mxu0 %vm2793_vm13, %v4062_v29 }
 0x2bb   : > { %3302 = vmatmul.mubr.msk.bf16.vlgmr.msra.gmra.mrb[16].mxu0 %vm2795_vm11, %v4062_v29 }
 0x2bc   : > { %v3283_v10 = vpop.f32.mrb[4].mxu1  ;;  %v4562_v11 = vpop.f32.mrb[4].mxu0 }
 0x2bd   : > { %v1040_v12 = vpop.f32.mrb[5].mxu1  ;;  %v4564_v13 = vpop.f32.mrb[5].mxu0  ;;  %vm1061_vm14 = vcmp.gt.f32.partialorder %v3283_v10, 0.0 }
 0x2be   : > { %v3284_v14 = vpop.f32.mrb[6].mxu1  ;;  %v4566_v15 = vpop.f32.mrb[6].mxu0  ;;  %vm1059_vm0 = vcmp.gt.f32.partialorder %v1040_v12, 0.0 }
 0x2bf   : > { %vm1062_vm15 = vcmp.gt.f32.partialorder %v3284_v14, 0.0  ;;  %v1043_v16 = vpop.f32.mrb[7].mxu1  ;;  %v3593_v17 = vpack.c.bf16 %v4566_v15, %v4562_v11  ;;  %v4570_v18 = vpop.f32.mrb[7].mxu0  ;;  %v3856_v15 = vld [vmem:[%s4992_s7 + $0x90] sm:$0xff]  }
 0x2c0   : > { %vm2799_vm1 = vmpackc.low %vm1062_vm15, %vm1061_vm14  ;;  %vm1060_vm2 = vcmp.gt.f32.partialorder %v1043_v16, 0.0  ;;  %v3590_v19 = vpack.c.bf16 %v4570_v18, %v4564_v13  ;;  %v3855_v13 = vld [vmem:[%s4992_s7 + $0x88] sm:$0xff]   ;;  %v3858_v18 = vld [vmem:[%s4992_s7 + $0xa0] sm:$0xff]  }
 0x2c1   : > { %vm2797_vm3 = vmpackc.low %vm1060_vm2, %vm1059_vm0 }
 0x2c2   : > { %3305 = vmatprep.mubr.msk.bf16.mxu0 %vm2797_vm3, %v4062_v29 }
 0x2c3   : > { %3306 = vmatmul.mubr.msk.bf16.gmra.mrb[20].mxu0 %vm2799_vm1, %v4062_v29  ;;  %vm4064_vm1 = vmmov 0  }
 0x2c4   : > { %v4576_v20 = vpop.f32.mrb[8].mxu0  ;;  %3411 = vmatprep.mubr.msk.bf16.mxu0 %vm1281_vm4, %v3841_v34 }
 0x2c5   : > { %v4578_v21 = vpop.f32.mrb[9].mxu0 }
 0x2c6   : > { %v4580_v22 = vpop.f32.mrb[10].mxu0 }
 0x2c7   : > { %v3599_v23 = vpack.c.bf16 %v4580_v22, %v4576_v20  ;;  %v4584_v24 = vpop.f32.mrb[11].mxu0  ;;  %v3860_v20 = vld [vmem:[%s4992_s7 + $0xb0] sm:$0xff]  }
 0x2c8   : > { %v3596_v25 = vpack.c.bf16 %v4584_v24, %v4578_v21  ;;  %v3861_v21 = vld [vmem:[%s4992_s7 + $0xb8] sm:$0xff]  }
 0x2cc   : > { %v4588_v26 = vpop.f32.mrb[12].mxu0 }
 0x2cd   : > { %v4590_v27 = vpop.f32.mrb[13].mxu0 }
 0x2ce   : > { %v4592_v28 = vpop.f32.mrb[14].mxu0 }
 0x2cf   : > { %v3605_v30 = vpack.c.bf16 %v4592_v28, %v4588_v26  ;;  %v4596_v31 = vpop.f32.mrb[15].mxu0 }
 0x2d0   : > { %v3602_v32 = vpack.c.bf16 %v4596_v31, %v4590_v27 }
 0x38e   : > { %v3303_v35 = vpop.f32.mrb[16].mxu0 }
 0x38f   : > { %v1165_v36 = vpop.f32.mrb[17].mxu0  ;;  %vm1198_vm5 = vcmp.gt.f32.partialorder %v3303_v35, 0.0 }
 0x390   : > { %v3304_v37 = vpop.f32.mrb[18].mxu0  ;;  %vm1196_vm7 = vcmp.gt.f32.partialorder %v1165_v36, 0.0 }
 0x391   : > { %vm1199_vm6 = vcmp.gt.f32.partialorder %v3304_v37, 0.0  ;;  %v1168_v38 = vpop.f32.mrb[19].mxu0 }
 0x392   : > { %vm4605_vm8 = vmpackc.low %vm1199_vm6, %vm1198_vm5  ;;  %vm1197_vm9 = vcmp.gt.f32.partialorder %v1168_v38, 0.0 }
 0x393   : > { %vm2833_vm10 = vmpackc.low %vm1197_vm9, %vm1196_vm7 }
 0x394   : > { %3309 = vmatprep.subr.msk.bf16.mxu1 %vm2833_vm10, %v4062_v29  ;;  %3403 = vmatprep.subr.msk.bf16.mxu0 %vm2833_vm10, %v4062_v29  ;;  %vm4679_vm6 = vmpackc.low %vm1281_vm4, %vm1281_vm4 }
 0x395   : > { %3310 = vmatpush3.bf16.msk.msra.mxu1 %vm2833_vm10, %v4062_v29  ;;  %3404 = vmatpush3.bf16.msk.msra.mxu0 %vm2833_vm10, %v4062_v29 }
 0x396   : > { %v3307_v40 = vpop.f32.mrb[20].mxu0  ;;  %3311 = vmatprep.subr.msk.bf16.mxu1 %vm4605_vm8, %v4062_v29  ;;  %3405 = vmatprep.subr.msk.bf16.mxu0 %vm4605_vm8, %v4062_v29 }
 0x397   : > { %v1181_v41 = vpop.f32.mrb[21].mxu0  ;;  %vm1202_vm11 = vcmp.gt.f32.partialorder %v3307_v40, 0.0 }
 0x398   : > { %v3308_v42 = vpop.f32.mrb[22].mxu0  ;;  %vm1200_vm13 = vcmp.gt.f32.partialorder %v1181_v41, 0.0 }
 0x399   : > { %vm1203_vm12 = vcmp.gt.f32.partialorder %v3308_v42, 0.0  ;;  %v1184_v43 = vpop.f32.mrb[23].mxu0  ;;  %3312 = vmatpush3.bf16.msk.msra.mxu1 %vm4605_vm8, %v4062_v29  ;;  %3406 = vmatpush3.bf16.msk.msra.mxu0 %vm4605_vm8, %v4062_v29 }
 0x39a   : > { %vm2839_vm14 = vmpackc.low %vm1203_vm12, %vm1202_vm11  ;;  %vm1201_vm15 = vcmp.gt.f32.partialorder %v1184_v43, 0.0 }
 0x39b   : > { %vm2837_vm0 = vmpackc.low %vm1201_vm15, %vm1200_vm13 }
 0x39c   : > { %3313 = vmatprep.subr.msk.bf16.mxu1 %vm2837_vm0, %v4062_v29  ;;  %3407 = vmatprep.subr.msk.bf16.mxu0 %vm2837_vm0, %v4062_v29 }
 0x39d   : > { %3314 = vmatpush3.bf16.msk.msra.mxu1 %vm2837_vm0, %v4062_v29  ;;  %3408 = vmatpush3.bf16.msk.msra.mxu0 %vm2837_vm0, %v4062_v29 }
 0x39e   : > { %3315 = vmatprep.subr.msk.bf16.mxu1 %vm2839_vm14, %v4062_v29  ;;  %3409 = vmatprep.subr.msk.bf16.mxu0 %vm2839_vm14, %v4062_v29 }
 0x3a1   : > { %3316 = vmatpush3.bf16.msk.msra.mxu1 %vm2839_vm14, %v4062_v29  ;;  %3410 = vmatpush3.bf16.msk.msra.mxu0 %vm2839_vm14, %v4062_v29 }
 0x3a2   : > { %3415 = vmatprep.subr.bf16.mxu0 %v3850_v44  ;;  %3551 = vmatprep.subr.bf16.mxu1 %v4063_v56 }
 0x3a4   : > { %3318 = vmatmul.mubr.msk.bf16.vlgmr.msra.gmra.mrb[8].mxu1 %vm1281_vm4, %v3842_v45  ;;  %3412 = vmatmul.mubr.msk.bf16.vlgmr.msra.gmra.mrb[24].mxu0 %vm1281_vm4, %v3843_v46 }
 0x3a5   : > { %3321 = vmatprep.mubr.msk.bf16.mxu1 %vm1281_vm4, %v3844_v47  ;;  %3416 = vmatpush3.bf16.msra.mxu0 %v3850_v44 }
 0x3a6   : > { %3417 = vmatprep.subr.bf16.mxu0 %v3851_v48 }
 0x3a9   : > { %3418 = vmatpush3.bf16.msra.mxu0 %v3851_v48 }
 0x3aa   : > { %3419 = vmatprep.subr.bf16.mxu0 %v3852_v54 }
 0x3ac   : > { %3322 = vmatmul.mubr.msk.bf16.gmra.mrb[12].mxu1 %vm1281_vm4, %v3845_v49 }
 0x3ad   : > { %3325 = vmatprep.mubr.msk.bf16.mxu1 %vm1281_vm4, %v3846_v50  ;;  %3420 = vmatpush3.bf16.msra.mxu0 %v3852_v54  ;;  %v4066_v54 = vmov 1.0  }
 0x3ae   : > { %3421 = vmatprep.subr.bf16.mxu0 %v3853_v55 }
 0x3b1   : > { %3422 = vmatpush3.bf16.msra.mxu0 %v3853_v55 }
 0x3b4   : > { %3326 = vmatmul.mubr.msk.bf16.gmra.mrb[16].mxu1 %vm1281_vm4, %v3847_v51 }
 0x3b5   : > { %3329 = vmatprep.mubr.msk.bf16.mxu1 %vm1281_vm4, %v3848_v52 }
 0x3bc   : > { %3330 = vmatmul.mubr.msk.bf16.gmra.mrb[20].mxu1 %vm1281_vm4, %v3849_v53 }
 0x3bd   : > { %3365 = vmatprep.mubr.msk.f32.mxu1 %vm4064_vm1, %v4065_v57 }
 0x477   : > { %v3319_v58 = vpop.f32.mrb[8].mxu1  ;;  %v3413_v59 = vpop.f32.mrb[24].mxu0 }
 0x478   : > { %vm1675_vm2 = vcmp.gt.f32.partialorder %v3413_v59, 0.0  ;;  %v1340_v60 = vpop.f32.mrb[9].mxu1  ;;  %v1658_v61 = vpop.f32.mrb[25].mxu0 }
 0x479   : > { %vm1673_vm3 = vcmp.gt.f32.partialorder %v1658_v61, 0.0  ;;  %v3320_v62 = vpop.f32.mrb[10].mxu1  ;;  %v3414_v63 = vpop.f32.mrb[26].mxu0  ;;  %v2888_v10 = vsel %vm1675_vm2, 1.0, %v4065_v57 }
 0x47a   : > { %v3556_v0 = vpack.c.bf16 %v3320_v62, %v3319_v58  ;;  %vm1676_vm5 = vcmp.gt.f32.partialorder %v3414_v63, 0.0  ;;  %v1343_v2 = vpop.f32.mrb[11].mxu1  ;;  %v1661_v4 = vpop.f32.mrb[27].mxu0  ;;  %v2886_v16 = vsel %vm1673_vm3, 1.0, %v4065_v57 }
 0x47b   : > { %v2889_v12 = vsel %vm1676_vm5, 1.0, %v4065_v57  ;;  %v3552_v14 = vpack.c.bf16 %v1343_v2, %v1340_v60  ;;  %vm1674_vm7 = vcmp.gt.f32.partialorder %v1661_v4, 0.0 }
 0x47c   : > { %v1686_v33 = vpack.c.bf16 %v2889_v12, %v2888_v10  ;;  %v2887_v34 = vsel %vm1674_vm7, 1.0, %v4065_v57 }
 0x47d   : > { %v1685_v35 = vpack.c.bf16 %v2887_v34, %v2886_v16  ;;  %3554 = vmatpush3.bf16.xpose.msk.msra.mxu1 %vm4679_vm6, %v3552_v14 }
 0x47e   : > { %3555 = vmatprep.subr.bf16.mxu1 %v4063_v56 }
 0x47f   : > { %3423 = vmatprep.mubr.msk.bf16.mxu0 %vm1281_vm4, %v1685_v35  ;;  %v3323_v36 = vpop.f32.mrb[12].mxu1 }
 0x480   : > { %3424 = vmatmul.mubr.msk.bf16.vlgmr.msra.gmra.mrb[28].mxu0 %vm1281_vm4, %v1686_v33  ;;  %v1356_v37 = vpop.f32.mrb[13].mxu1  ;;  %v3862_v33 = vld [vmem:[#allocation10 + $0x40] sm:$0xff]  }
 0x481   : > { %v3324_v38 = vpop.f32.mrb[14].mxu1 }
 0x482   : > { %v3564_v39 = vpack.c.bf16 %v3324_v38, %v3323_v36  ;;  %v1359_v40 = vpop.f32.mrb[15].mxu1  ;;  %v3863_v36 = vld [vmem:[%s4991_s6 + $0x80] sm:$0xff]  }
 0x483   : > { %v3560_v41 = vpack.c.bf16 %v1359_v40, %v1356_v37  ;;  %v3864_v37 = vld [vmem:[%s4991_s6 + $0x88] sm:$0xff]  }
 0x485   : > { %3558 = vmatpush3.bf16.xpose.msk.msra.mxu1 %vm4679_vm6, %v3556_v0 }
 0x486   : > { %3559 = vmatprep.subr.bf16.mxu1 %v4063_v56 }
 0x487   : > { %v3327_v42 = vpop.f32.mrb[16].mxu1 }
 0x488   : > { %v1372_v43 = vpop.f32.mrb[17].mxu1 }
 0x489   : > { %v3328_v44 = vpop.f32.mrb[18].mxu1 }
 0x48a   : > { %v3572_v45 = vpack.c.bf16 %v3328_v44, %v3327_v42  ;;  %v1375_v46 = vpop.f32.mrb[19].mxu1 }
 0x48b   : > { %v3568_v47 = vpack.c.bf16 %v1375_v46, %v1372_v43 }
 0x48d   : > { %3562 = vmatpush3.bf16.xpose.msk.msra.mxu1 %vm4679_vm6, %v3560_v41 }
 0x48e   : > { %3563 = vmatprep.subr.bf16.mxu1 %v4063_v56 }
 0x48f   : > { %v3331_v48 = vpop.f32.mrb[20].mxu1 }
 0x490   : > { %v1388_v49 = vpop.f32.mrb[21].mxu1 }
 0x491   : > { %v3332_v50 = vpop.f32.mrb[22].mxu1 }
 0x492   : > { %v3580_v51 = vpack.c.bf16 %v3332_v50, %v3331_v48  ;;  %v1391_v52 = vpop.f32.mrb[23].mxu1  ;;  %v3865_v48 = vld [vmem:[%s4992_s7 + $0xc0] sm:$0xff]  }
 0x493   : > { %v3576_v53 = vpack.c.bf16 %v1391_v52, %v1388_v49 }
 0x495   : > { %3566 = vmatpush3.bf16.xpose.msk.msra.mxu1 %vm4679_vm6, %v3564_v39 }
 0x496   : > { %3567 = vmatprep.subr.bf16.mxu1 %v4063_v56 }
 0x49d   : > { %3570 = vmatpush3.bf16.xpose.msk.msra.mxu1 %vm4679_vm6, %v3568_v47 }
 0x49e   : > { %3571 = vmatprep.subr.bf16.mxu1 %v4063_v56 }
 0x4a5   : > { %3574 = vmatpush3.bf16.xpose.msk.msra.mxu1 %vm4679_vm6, %v3572_v45 }
 0x4a6   : > { %3575 = vmatprep.subr.bf16.mxu1 %v4063_v56 }
 0x4ad   : > { %3578 = vmatpush3.bf16.xpose.msk.msra.mxu1 %vm4679_vm6, %v3576_v53  ;;  %v3867_v53 = vld [vmem:[%s4992_s7 + $0xd0] sm:$0xff]  }
 0x4ae   : > { %3579 = vmatprep.subr.bf16.mxu1 %v4063_v56 }
 0x4b5   : > { %3582 = vmatpush3.bf16.xpose.msk.msra.mxu1 %vm4679_vm6, %v3580_v51 }
 0x4b6   : > { %3583 = vmatprep.subr.bf16.mxu1 %v4063_v56 }
 0x4bc   : > { %3366 = vmatmul.mubr.msk.f32.vlgmr.msra.gmra.mrb[24].mxu1 %vm1281_vm4, %v4066_v54  ;;  %vm1837_vm4 = vcmask 261120  }
 0x4bd   : > { %3585 = vmatpush3.bf16.xpose.msra.mxu1 %v3584_v9  ;;  %3400 = vmatprep.mubr.msk.f32.mxu1 %vm4064_vm1, %v4065_v57  ;;  %vm4809_vm14 = vmpackc.low %vm1837_vm4, %vm1837_vm4 }
 0x4be   : > { %3586 = vmatprep.subr.bf16.mxu1 %v4063_v56  ;;  %3431 = vmatprep.mubr.msk.bf16.mxu0 %vm1837_vm4, %v3854_v1  ;;  %v3868_v1 = vld [vmem:[%s4992_s7 + $0xd8] sm:$0xff]  }
 0x4c5   : > { %3588 = vmatpush3.bf16.xpose.msra.mxu1 %v3587_v7 }
 0x4c6   : > { %3589 = vmatprep.subr.bf16.mxu1 %v4063_v56 }
 0x4cd   : > { %3591 = vmatpush3.bf16.xpose.msra.mxu1 %v3590_v19  ;;  %v3859_v19 = vld [vmem:[%s4992_s7 + $0xa8] sm:$0xff]  }
 0x4ce   : > { %3592 = vmatprep.subr.bf16.mxu1 %v4063_v56 }
 0x4d5   : > { %3594 = vmatpush3.bf16.xpose.msra.mxu1 %v3593_v17  ;;  %v3857_v17 = vld [vmem:[%s4992_s7 + $0x98] sm:$0xff]  }
 0x4d6   : > { %3595 = vmatprep.subr.bf16.mxu1 %v4063_v56 }
 0x4dd   : > { %3597 = vmatpush3.bf16.xpose.msra.mxu1 %v3596_v25 }
 0x4de   : > { %3598 = vmatprep.subr.bf16.mxu1 %v4063_v56 }
 0x4e5   : > { %3600 = vmatpush3.bf16.xpose.msra.mxu1 %v3599_v23 }
 0x4e6   : > { %3601 = vmatprep.subr.bf16.mxu1 %v4063_v56 }
 0x4ed   : > { %3603 = vmatpush3.bf16.xpose.msra.mxu1 %v3602_v32 }
 0x4ee   : > { %3604 = vmatprep.subr.bf16.mxu1 %v4063_v56 }
 0x4f5   : > { %3606 = vmatpush3.bf16.xpose.msra.mxu1 %v3605_v30 }
 0x4f6   : > { %3639 = vmatprep.subr.bf16.mxu1 %v4063_v56 }
 0x4fc   : > { %3401 = vmatmul.mubr.f32.vlgmr.msra.gmra.mrb[24].mxu1 %v4066_v54 }
 0x4fd   : > { %3548 = vmatprep.mubr.msk.f32.mxu1 %vm4064_vm1, %v4065_v57 }
 0x553   : > { %v3425_v3 = vpop.f32.mrb[28].mxu0 }
 0x554   : > { %v1751_v5 = vpop.f32.mrb[29].mxu0  ;;  %vm1768_vm8 = vcmp.gt.f32.partialorder %v3425_v3, 0.0  ;;  %v3869_v3 = vld [vmem:[%s4992_s7 + $0xe0] sm:$0xff]  }
 0x555   : > { %v3426_v7 = vpop.f32.mrb[30].mxu0  ;;  %vm1766_vm10 = vcmp.gt.f32.partialorder %v1751_v5, 0.0  ;;  %v3871_v5 = vld [vmem:[%s4992_s7 + $0xf0] sm:$0xff]  }
 0x556   : > { %vm1769_vm9 = vcmp.gt.f32.partialorder %v3426_v7, 0.0  ;;  %v1754_v8 = vpop.f32.mrb[31].mxu0  ;;  %v3872_v7 = vld [vmem:[%s4992_s7 + $0xf8] sm:$0xff]  }
 0x557   : > { %vm4756_vm11 = vmpackc.low %vm1769_vm9, %vm1768_vm8  ;;  %vm1767_vm12 = vcmp.gt.f32.partialorder %v1754_v8, 0.0 }
 0x558   : > { %vm4760_vm13 = vmpackc.low %vm1767_vm12, %vm1766_vm10 }
 0x559   : > { %3427 = vmatprep.subr.msk.bf16.mxu0 %vm4760_vm13, %v4062_v29 }
 0x55a   : > { %3428 = vmatpush3.bf16.msk.msra.mxu0 %vm4760_vm13, %v4062_v29 }
 0x55b   : > { %3429 = vmatprep.subr.msk.bf16.mxu0 %vm4756_vm11, %v4062_v29 }
 0x55e   : > { %3430 = vmatpush3.bf16.msk.msra.mxu0 %vm4756_vm11, %v4062_v29 }
 0x55f   : > { %3607 = vmatprep.subr.bf16.mxu0 %v4063_v56 }
 0x561   : > { %3432 = vmatmul.mubr.msk.bf16.vlgmr.msra.gmra.mrb[32].mxu0 %vm1837_vm4, %v3855_v13 }
 0x562   : > { %3435 = vmatprep.mubr.msk.bf16.mxu0 %vm1837_vm4, %v3856_v15 }
 0x569   : > { %3436 = vmatmul.mubr.msk.bf16.gmra.mrb[36].mxu0 %vm1837_vm4, %v3857_v17 }
 0x56a   : > { %3439 = vmatprep.mubr.msk.bf16.mxu0 %vm1837_vm4, %v3858_v18 }
 0x571   : > { %3440 = vmatmul.mubr.msk.bf16.gmra.mrb[40].mxu0 %vm1837_vm4, %v3859_v19 }
 0x572   : > { %3443 = vmatprep.mubr.msk.bf16.mxu0 %vm1837_vm4, %v3860_v20 }
 0x579   : > { %3444 = vmatmul.mubr.msk.bf16.gmra.mrb[44].mxu0 %vm1837_vm4, %v3861_v21 }
 0x57a   : > { %3479 = vmatprep.mubr.msk.f32.mxu0 %vm4064_vm1, %v4065_v57 }
 0x5cf   : > { %v1590_v34 = vpop.f32.mrb[24].mxu1 }
 0x5d0   : > { %v3402_v35 = vpop.f32.mrb[25].mxu1 }
 0x634   : > { %v3433_v22 = vpop.f32.mrb[32].mxu0 }
 0x635   : > { %v1896_v23 = vpop.f32.mrb[33].mxu0 }
 0x636   : > { %v3434_v24 = vpop.f32.mrb[34].mxu0 }
 0x637   : > { %v3612_v25 = vpack.c.bf16 %v3434_v24, %v3433_v22  ;;  %v1899_v26 = vpop.f32.mrb[35].mxu0 }
 0x638   : > { %v3608_v28 = vpack.c.bf16 %v1899_v26, %v1896_v23 }
 0x63a   : > { %3610 = vmatpush3.bf16.xpose.msk.msra.mxu0 %vm4809_vm14, %v3608_v28 }
 0x63b   : > { %3611 = vmatprep.subr.bf16.mxu0 %v4063_v56 }
 0x63c   : > { %v3437_v30 = vpop.f32.mrb[36].mxu0 }
 0x63d   : > { %v1912_v31 = vpop.f32.mrb[37].mxu0 }
 0x63e   : > { %v3438_v32 = vpop.f32.mrb[38].mxu0 }
 0x63f   : > { %v3620_v55 = vpack.c.bf16 %v3438_v32, %v3437_v30  ;;  %v1915_v58 = vpop.f32.mrb[39].mxu0 }
 0x640   : > { %v3616_v59 = vpack.c.bf16 %v1915_v58, %v1912_v31 }
 0x642   : > { %3614 = vmatpush3.bf16.xpose.msk.msra.mxu0 %vm4809_vm14, %v3612_v25 }
 0x643   : > { %3615 = vmatprep.subr.bf16.mxu0 %v4063_v56 }
 0x644   : > { %v3441_v60 = vpop.f32.mrb[40].mxu0 }
 0x645   : > { %v1928_v61 = vpop.f32.mrb[41].mxu0 }
 0x646   : > { %v3442_v62 = vpop.f32.mrb[42].mxu0 }
 0x647   : > { %v3628_v63 = vpack.c.bf16 %v3442_v62, %v3441_v60  ;;  %v1931_v0 = vpop.f32.mrb[43].mxu0 }
 0x648   : > { %v3624_v2 = vpack.c.bf16 %v1931_v0, %v1928_v61 }
 0x64a   : > { %3618 = vmatpush3.bf16.xpose.msk.msra.mxu0 %vm4809_vm14, %v3616_v59 }
 0x64b   : > { %3619 = vmatprep.subr.bf16.mxu0 %v4063_v56 }
 0x64c   : > { %v3445_v4 = vpop.f32.mrb[44].mxu0 }
 0x64d   : > { %v1944_v6 = vpop.f32.mrb[45].mxu0 }
 0x64e   : > { %v3446_v10 = vpop.f32.mrb[46].mxu0 }
 0x64f   : > { %v3636_v12 = vpack.c.bf16 %v3446_v10, %v3445_v4  ;;  %v1947_v14 = vpop.f32.mrb[47].mxu0 }
 0x650   : > { %v3632_v16 = vpack.c.bf16 %v1947_v14, %v1944_v6 }
 0x652   : > { %3622 = vmatpush3.bf16.xpose.msk.msra.mxu0 %vm4809_vm14, %v3620_v55 }
 0x653   : > { %3623 = vmatprep.subr.bf16.mxu0 %v4063_v56 }
 0x65a   : > { %3626 = vmatpush3.bf16.xpose.msk.msra.mxu0 %vm4809_vm14, %v3624_v2 }
 0x65b   : > { %3627 = vmatprep.subr.bf16.mxu0 %v4063_v56 }
 0x662   : > { %3630 = vmatpush3.bf16.xpose.msk.msra.mxu0 %vm4809_vm14, %v3628_v63 }
 0x663   : > { %3631 = vmatprep.subr.bf16.mxu0 %v4063_v56 }
 0x66a   : > { %3634 = vmatpush3.bf16.xpose.msk.msra.mxu0 %vm4809_vm14, %v3632_v16 }
 0x66b   : > { %3635 = vmatprep.subr.bf16.mxu0 %v4063_v56 }
 0x672   : > { %3638 = vmatpush3.bf16.xpose.msk.msra.mxu0 %vm4809_vm14, %v3636_v12 }
 0x673   : > { %3482 = vmatprep.subr.bf16.mxu0 %v4065_v57 }
 0x679   : > { %3480 = vmatmul.mubr.msk.f32.vlgmr.msra.gmra.mrb[48].mxu0 %vm1837_vm4, %v4066_v54 }
 0x67a   : > { %3483 = vmatpush3.bf16.msk.msra.mxu0 %vm4760_vm13, %v4062_v29  ;;  %3486 = vmatprep.mubr.msk.bf16.mxu0 %vm4064_vm1, %v4065_v57 }
 0x67b   : > { %3484 = vmatprep.subr.bf16.mxu0 %v4065_v57 }
 0x67e   : > { %3485 = vmatpush3.bf16.msk.msra.mxu0 %vm4756_vm11, %v4062_v29 }
 0x67f   : > { %3490 = vmatprep.subr.bf16.mxu0 %v4065_v57 }
 0x681   : > { %3487 = vmatmul.mubr.msk.bf16.vlgmr.msra.gmra.mrb[52].mxu0 %vm1837_vm4, %v3862_v33 }
 0x682   : > { %3494 = vmatprep.mubr.msk.bf16.mxu0 %vm4064_vm1, %v4065_v57  ;;  %3491 = vmatpush3.bf16.msra.mxu0 %v3863_v36  ;;  %vm2264_vm1 = vcmask 130048  }
 0x683   : > { %3492 = vmatprep.subr.bf16.mxu0 %v4065_v57  ;;  %vm4900_vm6 = vmpackc.low %vm2264_vm1, %vm2264_vm1 }
 0x686   : > { %3493 = vmatpush3.bf16.msra.mxu0 %v3864_v37 }
 0x74c   : > { %v2075_v38 = vpop.f32.mrb[48].mxu0 }
 0x74d   : > { %v4859_v39 = vadd.f32 %v2075_v38, %v1590_v34  ;;  %v3481_v40 = vpop.f32.mrb[49].mxu0 }
 0x754   : > { %v2130_v41 = vpop.f32.mrb[52].mxu0 }
 0x755   : > { %vm2137_vm15 = vcmp.gt.f32.partialorder %v2130_v41, 0.0  ;;  %v3488_v42 = vpop.f32.mrb[53].mxu0 }
 0x756   : > { %v2133_v43 = vpop.f32.mrb[54].mxu0  ;;  %v2963_v45 = vsel %vm2137_vm15, 1.0, %v4065_v57 }
 0x757   : > { %vm2138_vm0 = vcmp.gt.f32.partialorder %v2133_v43, 0.0  ;;  %v3489_v44 = vpop.f32.mrb[55].mxu0 }
 0x758   : > { %v2964_v46 = vsel %vm2138_vm0, 1.0, %v4065_v57  ;;  %v3866_v57 = vld [vmem:[%s4992_s7 + $0xc8] sm:$0xff]  }
 0x759   : > { %v2143_v47 = vpack.c.bf16 %v2964_v46, %v2963_v45 }
 0x75b   : > { %3495 = vmatmul.mubr.msk.bf16.vlgmr.msra.gmra.mrb[56].mxu0 %vm1837_vm4, %v2143_v47 }
 0x75c   : > { %3500 = vmatprep.mubr.msk.bf16.mxu0 %vm2264_vm1, %v3865_v48 }
 0x82e   : > { %v2193_v49 = vpop.f32.mrb[56].mxu0 }
 0x82f   : > { %v3496_v50 = vpop.f32.mrb[57].mxu0  ;;  %vm2200_vm2 = vcmp.gt.f32.partialorder %v2193_v49, 0.0 }
 0x830   : > { %v2196_v51 = vpop.f32.mrb[58].mxu0 }
 0x831   : > { %vm2201_vm3 = vcmp.gt.f32.partialorder %v2196_v51, 0.0  ;;  %v3497_v52 = vpop.f32.mrb[59].mxu0 }
 0x832   : > { %vm2994_vm5 = vmpackc.low %vm2201_vm3, %vm2200_vm2 }
 0x833   : > { %3498 = vmatprep.subr.msk.bf16.mxu0 %vm2994_vm5, %v4062_v29 }
 0x834   : > { %3499 = vmatpush3.bf16.msk.msra.mxu0 %vm2994_vm5, %v4062_v29  ;;  %v3870_v29 = vld [vmem:[%s4992_s7 + $0xe8] sm:$0xff]  }
 0x837   : > { %3501 = vmatmul.mubr.msk.bf16.vlgmr.msra.gmra.mrb[60].mxu0 %vm2264_vm1, %v3866_v57 }
 0x838   : > { %3504 = vmatprep.mubr.msk.bf16.mxu0 %vm2264_vm1, %v3867_v53 }
 0x83f   : > { %3505 = vmatmul.mubr.msk.bf16.gmra.mrb[64].mxu0 %vm2264_vm1, %v3868_v1 }
 0x840   : > { %3508 = vmatprep.mubr.msk.bf16.mxu0 %vm2264_vm1, %v3869_v3 }
 0x847   : > { %3509 = vmatmul.mubr.msk.bf16.gmra.mrb[68].mxu0 %vm2264_vm1, %v3870_v29 }
 0x848   : > { %3512 = vmatprep.mubr.msk.bf16.mxu0 %vm2264_vm1, %v3871_v5 }
 0x84f   : > { %3513 = vmatmul.mubr.msk.bf16.gmra.mrb[72].mxu0 %vm2264_vm1, %v3872_v7 }
 0x90a   : > { %v3502_v8 = vpop.f32.mrb[60].mxu0 }
 0x90b   : > { %v2323_v9 = vpop.f32.mrb[61].mxu0 }
 0x90c   : > { %v3503_v11 = vpop.f32.mrb[62].mxu0 }
 0x90d   : > { %v3644_v13 = vpack.c.bf16 %v3503_v11, %v3502_v8  ;;  %v2326_v15 = vpop.f32.mrb[63].mxu0 }
 0x90e   : > { %v3640_v18 = vpack.c.bf16 %v2326_v15, %v2323_v9 }
 0x910   : > { %3642 = vmatpush3.bf16.xpose.msk.msra.mxu1 %vm4900_vm6, %v3640_v18 }
 0x911   : > { %3643 = vmatprep.subr.bf16.mxu1 %v4063_v56 }
 0x912   : > { %v3506_v19 = vpop.f32.mrb[64].mxu0 }
 0x913   : > { %v2339_v20 = vpop.f32.mrb[65].mxu0 }
 0x914   : > { %v3507_v21 = vpop.f32.mrb[66].mxu0 }
 0x915   : > { %v3652_v22 = vpack.c.bf16 %v3507_v21, %v3506_v19  ;;  %v2342_v23 = vpop.f32.mrb[67].mxu0 }
 0x916   : > { %v3648_v24 = vpack.c.bf16 %v2342_v23, %v2339_v20 }
 0x918   : > { %3646 = vmatpush3.bf16.xpose.msk.msra.mxu1 %vm4900_vm6, %v3644_v13 }
 0x919   : > { %3647 = vmatprep.subr.bf16.mxu1 %v4063_v56 }
 0x91a   : > { %v3510_v25 = vpop.f32.mrb[68].mxu0 }
 0x91b   : > { %v2355_v26 = vpop.f32.mrb[69].mxu0 }
 0x91c   : > { %v3511_v27 = vpop.f32.mrb[70].mxu0 }
 0x91d   : > { %v3660_v28 = vpack.c.bf16 %v3511_v27, %v3510_v25  ;;  %v2358_v30 = vpop.f32.mrb[71].mxu0 }
 0x91e   : > { %v3656_v31 = vpack.c.bf16 %v2358_v30, %v2355_v26 }
 0x920   : > { %3650 = vmatpush3.bf16.xpose.msk.msra.mxu1 %vm4900_vm6, %v3648_v24 }
 0x921   : > { %3651 = vmatprep.subr.bf16.mxu1 %v4063_v56 }
 0x922   : > { %v3514_v32 = vpop.f32.mrb[72].mxu0 }
 0x923   : > { %v2371_v55 = vpop.f32.mrb[73].mxu0 }
 0x924   : > { %v3515_v58 = vpop.f32.mrb[74].mxu0 }
 0x925   : > { %v3668_v59 = vpack.c.bf16 %v3515_v58, %v3514_v32  ;;  %v2374_v60 = vpop.f32.mrb[75].mxu0 }
 0x926   : > { %v3664_v61 = vpack.c.bf16 %v2374_v60, %v2371_v55 }
 0x928   : > { %3654 = vmatpush3.bf16.xpose.msk.msra.mxu1 %vm4900_vm6, %v3652_v22 }
 0x929   : > { %3655 = vmatprep.subr.bf16.mxu1 %v4063_v56 }
 0x930   : > { %3658 = vmatpush3.bf16.xpose.msk.msra.mxu1 %vm4900_vm6, %v3656_v31 }
 0x931   : > { %3659 = vmatprep.subr.bf16.mxu1 %v4063_v56 }
 0x938   : > { %3662 = vmatpush3.bf16.xpose.msk.msra.mxu1 %vm4900_vm6, %v3660_v28 }
 0x939   : > { %3663 = vmatprep.subr.bf16.mxu1 %v4063_v56 }
 0x940   : > { %3666 = vmatpush3.bf16.xpose.msk.msra.mxu1 %vm4900_vm6, %v3664_v61 }
 0x941   : > { %3667 = vmatprep.subr.bf16.mxu1 %v4063_v56 }
 0x948   : > { %3670 = vmatpush3.bf16.xpose.msk.msra.mxu1 %vm4900_vm6, %v3668_v59 }
 0x94f   : > { %3549 = vmatmul.mubr.msk.f32.vlgmr.msra.gmra.mrb[26].mxu1 %vm2264_vm1, %v4066_v54 }
 0xa22   : > { %v2502_v62 = vpop.f32.mrb[26].mxu1 }
 0xa23   : > { %v3688_v63 = vadd.f32 %v4859_v39, %v2502_v62  ;;  %v3550_v0 = vpop.f32.mrb[27].mxu1 }
 0xa25   : > { %2507 = vst [vmem:[%s4272_s25] sm:$0x1] %v3688_v63 }
 0xa26 PF: > { %s3021_s14 = sshll.u32 %s4040_s9, 4  ;;  %s2521_s11 = sshll.u32 %s4272_s25, 4  ;;  %s2522_s11 = int_to_ptr.vmem [resolvable:$true] %s2521_s11 }
 0xa27   : > { %s4935_s21 = scalar_lea.hbm %s4993_s8, %s3021_s14  ;;  %s5040_s10 = sand.u32 1, %s4028_s28  }
 0xa28   : > { %s2509_s15 = scalar_lea.sflag [#allocation5], %s5040_s10  ;;  %s3946_s1 = scalar_lea.vmem %s2522_s11, 16 }
 0xa29   : > { %p3947_p4 = scmp.ne.s32.totalorder %s2522_s11, %s3946_s1  ;;  %p5041_p5 = scmp.ne.s32.totalorder %s5007_s18, 0 }
 0xa2a   : > { %s4067_s0 = smov [#allocation11]  }
 0xa2b   : > { %p3948_p6 = pnand %p3947_p4, %p5041_p5  ;;  %s3950_s13 = sshll.u32 %s4067_s0, 4  ;;  %s3951_s13 = int_to_ptr.vmem [resolvable:$false] %s3950_s13 }
 0xa2c   : > { %s3952_s16 = scalar_lea.vmem %s3951_s13, 32  ;;  %p3953_p8 = scmp.lt.s32.totalorder %s2522_s11, %s3951_s13 }
 0xa2d   : > { %p3949_p7 = pneg %p3948_p6  ;;  %p3954_p11 = scmp.lt.s32.totalorder %s3952_s16, %s3946_s1 }
 0xa2f   : > { %p3955_p12 = por %p3954_p11, %p3953_p8 }
 0xa31   : > { %p3956_p1 = pnand %p3955_p12, %p3949_p7 }
 0xa33   : > { %3959 = shalt.err (!%p3956_p1)
}
 0xa34   : > { %s3960_s9 = scalar_lea.hbm %s4935_s21, 16  ;;  %s3964_s24 = scalar_lea.hbm %s4993_s8, 32 }
 0xa35   : > { %p3961_p9 = scmp.ne.s32.totalorder %s4935_s21, %s3960_s9  ;;  %p3965_p2 = scmp.lt.u32.totalorder %s4935_s21, %s4993_s8 }
 0xa36   : > { %p3966_p3 = scmp.lt.u32.totalorder %s3964_s24, %s3960_s9  ;;  %p3968_p4 = scmp.lt.u32.totalorder %s3960_s9, %s4935_s21 }
 0xa37   : > { %p3962_p10 = pnand %p3961_p9, %p5041_p5 }
 0xa38   : > { %p3967_p13 = por %p3966_p3, %p3965_p2 }
 0xa39   : > { %p3963_p0 = pneg %p3962_p10 }
 0xa3a   : > { %p3969_p6 = por %p3968_p4, %p3967_p13 }
 0xa3c   : > { %p3970_p7 = pnand %p3969_p6, %p3963_p0 }
 0xa3e   : > { %3973 = shalt.err (!%p3970_p7)
}
 0xa3f   : > { %3711 = dma.vmem_to_hbm [thread:$0]  (%p5041_p5), %s2522_s11, 16, %s4935_s21, %s2509_s15  }
 0xa40 PF: > { %p3738_p8 = scmp.ge.s32.totalorder %s4052_s12, 2  ;;  %s2533_s14 = sand.u32 1, %s4024_s27  }
 0xa41   : > { %p5042_p11 = scmp.ne.s32.totalorder %s5009_s19, 0  ;;  %s2534_s17 = scalar_lea.sflag [#allocation5], %s2533_s14 }
 0xa43   : > { %p3727_p12 = pnand %p3738_p8, %p5042_p11 }
 0xa45   : > { %4019 = dma.done.wait (!%p3727_p12), %s2534_s17, 16  }
 0xa46   : > { %4021 = vsyncadd (!%p3727_p12), %s2534_s17, 4294967280  ;;  %s24_s12 = sadd.s32 1, %s4052_s12   ;;  %s5043_s30 = sld [smem:[#allocation16_spill]] }
 0xa47   : > { %p21_p1 = scmp.ge.s32.totalorder %s24_s12, 10   ;;  %s5044_s9 = sld [smem:[#allocation17_spill]] }
 0xa48   : > { %s5045_s10 = sld [smem:[#allocation18_spill]]  ;;  %s5046_s11 = sld [smem:[#allocation19_spill]] }
 0xa49   : > { %s5047_s27 = smov %s4028_s28  ;;  %s5048_s28 = smov %s4032_s29 }
 0xa4a   : > { %s5049_s29 = smov %s4193_s26  ;;  %23 = sbr.rel (!%p21_p1) target bundleno = 11 (0xb), region = 127 }
 0xa51   :  { %2538 = vsyncpa [#allocation4], 1 }
 0xa52   :  { %2540 = vsyncpa [#allocation4 + $0x1], 1 }
 0xa53   :  { %2541 = vsyncpa [#allocation5], 1 }
 0xa54   :  { %2543 = vsyncpa [#allocation5 + $0x1], 1 }
 0xa55   :  { %2544 = vsyncpa [#allocation6], 1 }
 0xa56   :  { %2546 = vsyncpa [#allocation6 + $0x1], 1 }
 0xa57   :  { %2547 = vsyncpa [#allocation8], 1 }

</bundles_post_ra>
